<compile_context>
chip_gen: v7x
topology: tpu7x:2x2x1
jax: 0.10.0
libtpu: 0.0.40
codegen_flags: <defaults>
</compile_context>

<pallas_src>
import functools

import jax
import jax.numpy as jnp
from jax.experimental import pallas as pl
from jax.experimental.pallas import tpu as pltpu


def _round_up(x, m):
    return (x + m - 1) // m * m


def _tpu_hw():
    """Best-effort (physical VMEM bytes per core, TensorCores per chip).

    Detection failures fall back to conservative values (v7x-like: 64 MiB
    VMEM, 1 core) which are safe on every generation.
    """
    vmem_phys = 64 << 20
    cores = 1
    try:
        info = pltpu.get_tpu_info()
        vmem_phys = int(getattr(info, "vmem_capacity_bytes", vmem_phys))
    except Exception:
        pass
    try:
        kind = jax.devices()[0].device_kind.lower()
        if "v7" in kind:
            cores = 2                        # 2 TensorCores/chip on v7x
            vmem_phys = min(vmem_phys, 64 << 20)
        elif "v5" in kind or "v6" in kind:
            vmem_phys = max(vmem_phys, 128 << 20)
    except Exception:
        pass
    return vmem_phys, cores


def prepare_fc_params(w, b, *, weight_dtype=jnp.bfloat16, tk_max=8192):
    """One-time nn.Linear parameter prep.  Call OUTSIDE the per-step hot path.

    Pads N to a lane-aligned multiple of 128, pads K to a multiple of the
    chosen K tile, and casts W to the streaming dtype (bf16 by default;
    accumulation in the kernel stays f32).  Doing this once here avoids the
    full-weight HBM pad/cast copy on every forward call.

    Returns (w_prepared, b_prepared, meta) where meta holds the static
    tiling parameters for `image_to_linear`.
    """
    K, N = w.shape
    assert b.shape == (N,)

    vmem_phys, cores = _tpu_hw()
    # Leave headroom for compiler-internal scratch: 48 MiB cap on v7x,
    # ~112 MiB on v5e/v6e.
    vmem_cap = int(max(vmem_phys - (16 << 20), 32 << 20))

    N_pad = _round_up(N, 128)
    # Split N across both TensorCores only where there are 2 per chip (v7x).
    n_blocks = cores if (cores > 1 and N_pad % (cores * 128) == 0) else 1
    tn = N_pad // n_blocks

    # K tile: as large as fits (amortizes the ~0.35 us/step pipeline
    # overhead) while keeping the double-buffered W tiles inside roughly
    # half of this generation's VMEM budget.
    w_bytes = jnp.dtype(weight_dtype).itemsize
    tk_fit = ((vmem_cap // 2) // (2 * tn * w_bytes)) // 128 * 128
    tk = int(max(128, min(_round_up(K, 128), tk_max, tk_fit)))
    K_pad = _round_up(K, tk)

    w_p = w
    if (K_pad, N_pad) != (K, N):
        # Zero rows/cols contribute nothing to the dot; done exactly once.
        w_p = jnp.pad(w_p, ((0, K_pad - K), (0, N_pad - N)))
    w_p = w_p.astype(weight_dtype)
    b_p = jnp.pad(b, (0, N_pad - N)).astype(jnp.float32).reshape(1, N_pad)

    meta = dict(tk=tk, n_blocks=n_blocks, n_out=N, vmem_cap=vmem_cap)
    return w_p, b_p, meta


def fc_kernel(x_ref, w_ref, b_ref, o_ref):
    """One (N-block, K-tile) grid step of y = x @ W + b.

    The f32 output block is VMEM-resident across the K ("arbitrary") axis:
    it is initialized with the broadcast bias at k == 0 and accumulated into
    directly (no extra scratch, no epilogue pass).
    """
    @pl.when(pl.program_id(1) == 0)
    def _init_with_bias():
        o_ref[...] = jnp.broadcast_to(b_ref[...], o_ref.shape)

    o_ref[...] += jnp.dot(
        x_ref[...], w_ref[...], preferred_element_type=jnp.float32
    )


def linear_pallas(x2d, w_p, b_p, *, tk, n_blocks, n_out, vmem_cap):
    """x2d @ w_p + b_p with pre-prepared (padded / cast) weights.

    x2d: (B, K)        activations (any float dtype)
    w_p: (K_pad, N_pad) prepared weights (bf16 or f32)
    b_p: (1, N_pad)    f32 bias
    Returns (B, n_out) f32.
    """
    B, K = x2d.shape
    K_pad, N_pad = w_p.shape
    assert K_pad % tk == 0 and N_pad % (n_blocks * 128) == 0
    tn = N_pad // n_blocks
    grid_k = K_pad // tk

    # Per-call activation prep is cheap (x is B x K, tiny next to W): pad the
    # contraction dim to the pre-chosen K_pad and stream x in W's dtype.
    if K_pad != K:
        x2d = jnp.pad(x2d, ((0, 0), (0, K_pad - K)))
    if x2d.dtype != w_p.dtype:
        x2d = x2d.astype(w_p.dtype)

    bytes_in = jnp.dtype(w_p.dtype).itemsize
    needed = (
        2 * tk * tn * bytes_in       # W double buffer (dominant stream)
        + 2 * B * tk * bytes_in      # x double buffer
        + B * tn * 4                 # resident f32 output block
        + 2 * tn * 4                 # bias double buffer
    )
    vmem_limit = int(min(max(needed + (8 << 20), 32 << 20), vmem_cap))

    out = pl.pallas_call(
        fc_kernel,
        out_shape=jax.ShapeDtypeStruct((B, N_pad), jnp.float32),
        grid_spec=pltpu.PrefetchScalarGridSpec(
            num_scalar_prefetch=0,
            grid=(n_blocks, grid_k),
            in_specs=[
                pl.BlockSpec((B, tk), lambda n, k: (0, k)),    # x K-slice
                pl.BlockSpec((tk, tn), lambda n, k: (k, n)),   # W tile
                pl.BlockSpec((1, tn), lambda n, k: (0, n)),    # bias
            ],
            out_specs=pl.BlockSpec((B, tn), lambda n, k: (0, n)),
        ),
        compiler_params=pltpu.CompilerParams(
            dimension_semantics=("parallel", "arbitrary"),
            vmem_limit_bytes=vmem_limit,
        ),
    )(x2d, w_p, b_p)

    return out[:, :n_out]


def parallel_unet(x):
    # Placeholder for ParallelUNet (definition not provided in the source).
    # Shape-preserving identity so the downstream Flatten + Linear semantics
    # (flatten over C*H*W, then fc) match the PyTorch module exactly.
    # TODO(synk): implement ParallelUNet once its definition is available.
    return x


@functools.partial(
    jax.jit, static_argnames=("tk", "n_blocks", "n_out", "vmem_cap")
)
def image_to_linear(x, w_p, b_p, *, tk, n_blocks, n_out, vmem_cap):
    x = parallel_unet(x)                          # (B, C, H, W)
    x2d = x.reshape(x.shape[0], -1)               # Flatten: view(B, -1)
    return linear_pallas(                         # nn.Linear
        x2d, w_p, b_p,
        tk=tk, n_blocks=n_blocks, n_out=n_out, vmem_cap=vmem_cap,
    )


if __name__ == "__main__":
    # Small shapes consistent with the module: image (B, 3, H, W),
    # fc: Linear(C*H*W -> 1000).  (Original uses 256x256; scaled to 16x16.)
    # Note: throughput per weight-stream scales ~linearly with B — batch more
    # rows per call when the serving path allows it.
    B, C, H, W = 2, 3, 16, 16
    K = C * H * W          # 768
    N = 1000               # fc out_features, as in the module

    key = jax.random.PRNGKey(0)
    kx, kw, kb = jax.random.split(key, 3)

    x = jax.random.normal(kx, (B, C, H, W), dtype=jnp.float32)

    # Deterministic nn.Linear-style init: U(-1/sqrt(K), 1/sqrt(K)).
    bound = 1.0 / (K ** 0.5)
    w = jax.random.uniform(kw, (K, N), minval=-bound, maxval=bound,
                           dtype=jnp.float32)
    b = jax.random.uniform(kb, (N,), minval=-bound, maxval=bound,
                           dtype=jnp.float32)

    x2d = x.reshape(B, -1)
    ref_f32 = x2d @ w + b

    # --- Default path: bf16-streamed weights, f32 accumulation. -----------
    w_bf, b_bf, meta_bf = prepare_fc_params(w, b, weight_dtype=jnp.bfloat16)
    out_bf = jax.block_until_ready(image_to_linear(x, w_bf, b_bf, **meta_bf))
    assert out_bf.shape == (B, N)
    # Tight check vs. a bf16-rounded-input reference (same rounding as MXU).
    ref_bf = (x2d.astype(jnp.bfloat16).astype(jnp.float32)
              @ w.astype(jnp.bfloat16).astype(jnp.float32)) + b
    assert jnp.allclose(out_bf, ref_bf, atol=2e-3, rtol=2e-3)
    # Loose sanity check vs. full-f32 reference (bf16 input rounding only).
    assert jnp.allclose(out_bf, ref_f32, atol=5e-2, rtol=5e-2)

    # --- Exact-f32 streaming path. -----------------------------------------
    w_f32, b_f32, meta_f32 = prepare_fc_params(w, b, weight_dtype=jnp.float32)
    out_f32 = jax.block_until_ready(
        image_to_linear(x, w_f32, b_f32, **meta_f32))
    assert out_f32.shape == (B, N)
    assert jnp.allclose(out_f32, ref_f32, atol=1e-4, rtol=1e-4)

    print("KERNEL_OK")
</pallas_src>

<mosaic_0001>
module attributes {stable_mosaic.version = 11 : i64} {
  func.func @fc_kernel(%arg0: i32, %arg1: i32, %arg2: memref<2x768xbf16, #tpu.memory_space<vmem>>, %arg3: memref<768x1024xbf16, #tpu.memory_space<vmem>>, %arg4: memref<1x1024xf32, #tpu.memory_space<vmem>>, %arg5: memref<2x1024xf32, #tpu.memory_space<vmem>>) attributes {dimension_semantics = [#tpu.dimension_semantics<parallel>, #tpu.dimension_semantics<arbitrary>], iteration_bounds = array<i64: 1, 1>, scalar_prefetch = 0 : i64, scratch_operands = 0 : i64, tpu.core_type = #tpu.core_type<tc>, window_params = [{transform_indices = @transform_0, window_bounds = array<i64: 2, 768>}, {transform_indices = @transform_1, window_bounds = array<i64: 768, 1024>}, {transform_indices = @transform_2, window_bounds = array<i64: 1, 1024>}, {transform_indices = @transform_3, window_bounds = array<i64: 2, 1024>}]} {
    %c0_i32 = arith.constant 0 : i32
    %0 = arith.cmpi eq, %arg1, %c0_i32 : i32
    %1 = arith.extui %0 : i1 to i32
    %c0_i32_0 = arith.constant 0 : i32
    %2 = arith.cmpi ne, %1, %c0_i32_0 : i32
    scf.if %2 {
      %c0_8 = arith.constant 0 : index
      %c0_9 = arith.constant 0 : index
      %9 = vector.load %arg4[%c0_8, %c0_9] : memref<1x1024xf32, #tpu.memory_space<vmem>>, vector<1x1024xf32>
      %10 = vector.shape_cast %9 : vector<1x1024xf32> to vector<1x1024xf32>
      %11 = vector.broadcast %10 : vector<1x1024xf32> to vector<2x1024xf32>
      %c0_10 = arith.constant 0 : index
      %c0_11 = arith.constant 0 : index
      %12 = vector.load %arg5[%c0_10, %c0_11] : memref<2x1024xf32, #tpu.memory_space<vmem>>, vector<2x1024xf32>
      tpu.vector_store %arg5[%c0_10, %c0_11], %11 {strides = array<i32>} : memref<2x1024xf32, #tpu.memory_space<vmem>>, vector<2x1024xf32>,
    } else {
    }
    %c0 = arith.constant 0 : index
    %c0_1 = arith.constant 0 : index
    %3 = vector.load %arg5[%c0, %c0_1] : memref<2x1024xf32, #tpu.memory_space<vmem>>, vector<2x1024xf32>
    %c0_2 = arith.constant 0 : index
    %c0_3 = arith.constant 0 : index
    %4 = vector.load %arg2[%c0_2, %c0_3] : memref<2x768xbf16, #tpu.memory_space<vmem>>, vector<2x768xbf16>
    %c0_4 = arith.constant 0 : index
    %c0_5 = arith.constant 0 : index
    %5 = vector.load %arg3[%c0_4, %c0_5] : memref<768x1024xbf16, #tpu.memory_space<vmem>>, vector<768x1024xbf16>
    %cst = arith.constant dense<0.000000e+00> : vector<2x1024xf32>
    %6 = tpu.matmul %4, %5, %cst {dimension_numbers = #tpu.dot_dimension_numbers<[1], [0], [0], [1], [0, 0, 1, 1], [], []>} : vector<2x768xbf16>, vector<768x1024xbf16>, vector<2x1024xf32> -> vector<2x1024xf32>
    %7 = arith.addf %3, %6 : vector<2x1024xf32>
    %c0_6 = arith.constant 0 : index
    %c0_7 = arith.constant 0 : index
    %8 = vector.load %arg5[%c0_6, %c0_7] : memref<2x1024xf32, #tpu.memory_space<vmem>>, vector<2x1024xf32>
    tpu.vector_store %arg5[%c0_6, %c0_7], %7 {strides = array<i32>} : memref<2x1024xf32, #tpu.memory_space<vmem>>, vector<2x1024xf32>,
    return
  }
  func.func @transform_0(%arg0: i32, %arg1: i32) -> (i32, i32) {
    %c0_i32 = arith.constant 0 : i32
    %c0_i32_0 = arith.constant 0 : i32
    return %c0_i32, %arg1 : i32, i32
  }
  func.func @transform_1(%arg0: i32, %arg1: i32) -> (i32, i32) {
    %c0_i32 = arith.constant 0 : i32
    return %arg1, %arg0 : i32, i32
  }
  func.func @transform_2(%arg0: i32, %arg1: i32) -> (i32, i32) {
    %c0_i32 = arith.constant 0 : i32
    %c0_i32_0 = arith.constant 0 : i32
    return %c0_i32, %arg0 : i32, i32
  }
  func.func @transform_3(%arg0: i32, %arg1: i32) -> (i32, i32) {
    %c0_i32 = arith.constant 0 : i32
    %c0_i32_0 = arith.constant 0 : i32
    return %c0_i32, %arg0 : i32, i32
  }
}

</mosaic_0001>

<bundles_post_ra>
// kernel: image_to_linear.1
= control target key start
LH: loop header
LB: loop body
LE: loop exit
PB: predicated region body
PF: predicated region fallthrough
CT: control target
= control target key end

     0   :  { %8 = vsyncpa [#allocation3], 0  ;;  %s3666_s0 = inlined_call_operand.vmem [shape: bf16[2,768], index: 0, kind: input, shape index: {}]   ;;  %s3667_s1 = inlined_call_operand.hbm [shape: bf16[768,1024], index: 1, kind: input, shape index: {}]   ;;  %s3668_s2 = inlined_call_operand.hbm [shape: f32[1,1024], index: 2, kind: input, shape index: {}]   ;;  %s3669_s3 = inlined_call_operand.hbm [shape: f32[2,1024], index: 3, kind: output, shape index: {}]  }
   0x1   :  { %9 = vsyncpa [#allocation6], 0 }
   0x2   :  { %10 = vsyncpa [#allocation4], 0  ;;  %s3530_s12 = smov [#allocation2]   ;;  %s3458_s16 = scalar_lea.hbm %s3667_s1, 49152 }
   0x3   :  { %s18_s13 = sshll.u32 %s3530_s12, 4  ;;  %p3459_p0 = scmp.ne.s32.totalorder %s3667_s1, %s3458_s16  ;;  %s19_s13 = int_to_ptr.vmem [resolvable:$true] %s18_s13 }
   0x4   :  { %p3462_p1 = scmp.lt.u32.totalorder %s3458_s16, %s3667_s1 }
   0x6   :  { %p3464_p2 = pnand %p3462_p1, %p3459_p0 }
   0x8   :  { %3467 = shalt.err (!%p3464_p2)
}
   0x9   :  { %s3468_s21 = scalar_lea.vmem %s19_s13, 49152  ;;  %p3473_p4 = scmp.lt.s32.totalorder %s19_s13, %s19_s13 }
   0xa   :  { %p3469_p3 = scmp.ne.s32.totalorder %s19_s13, %s3468_s21  ;;  %p3474_p5 = scmp.lt.s32.totalorder %s3468_s21, %s3468_s21 }
   0xc   :  { %p3475_p6 = por %p3474_p5, %p3473_p4 }
   0xe   :  { %p3476_p7 = pnand %p3475_p6, %p3469_p3 }
  0x10   :  { %3479 = shalt.err (!%p3476_p7)
}
  0x11   :  { %s3531_s22 = smov 512   ;;  %s3532_s23 = smov 32  }
  0x12   :  { %24 = dma.hbm_to_vmem [thread:$0]  %s3667_s1, 49152, %s19_s13, [#allocation3], %s3531_s22, %s3531_s22, %s3532_s23  }
  0x13   :  { %s3533_s26 = smov [#allocation5]   ;;  %s3480_s30 = scalar_lea.hbm %s3668_s2, 128 }
  0x14   :  { %s31_s27 = sshll.u32 %s3533_s26, 4  ;;  %p3481_p8 = scmp.ne.s32.totalorder %s3668_s2, %s3480_s30  ;;  %s32_s27 = int_to_ptr.vmem [resolvable:$true] %s31_s27 }
  0x15   :  { %p3484_p9 = scmp.lt.u32.totalorder %s3480_s30, %s3668_s2 }
  0x17   :  { %p3486_p10 = pnand %p3484_p9, %p3481_p8 }
  0x19   :  { %3489 = shalt.err (!%p3486_p10)
}
  0x1a   :  { %s3490_s8 = scalar_lea.vmem %s32_s27, 128  ;;  %p3495_p12 = scmp.lt.s32.totalorder %s32_s27, %s32_s27 }
  0x1b   :  { %p3491_p11 = scmp.ne.s32.totalorder %s32_s27, %s3490_s8  ;;  %p3496_p13 = scmp.lt.s32.totalorder %s3490_s8, %s3490_s8 }
  0x1d   :  { %p3497_p0 = por %p3496_p13, %p3495_p12 }
  0x1f   :  { %p3498_p1 = pnand %p3497_p0, %p3491_p11 }
  0x21   :  { %3501 = shalt.err (!%p3498_p1)
}
  0x22   :  { %34 = dma.hbm_to_vmem [thread:$0]  %s3668_s2, 128, %s32_s27, [#allocation6]  }
  0x23   :  { %3524 = dma.done.wait [#allocation3], 49152  }
  0x24   :  { %3525 = vsyncadd [#allocation3], 4294918144 }
  0x25   :  { %3526 = dma.done.wait [#allocation6], 128  }
  0x26   :  { %3527 = vsyncadd [#allocation6], 4294967168  ;;  %v120_v0 = vld [vmem:[#allocation2] sm:$0xff]  ;;  %v121_v2 = vld [vmem:[#allocation2 + $0x8] sm:$0xff]  ;;  %v47_v32 = vlaneseq  ;;  %v3534_v33 = vmov 1966171168  }
  0x27   :  { %v124_v1 = vld [vmem:[#allocation2 + $0x20] sm:$0xff]  ;;  %v125_v4 = vld [vmem:[#allocation2 + $0x28] sm:$0xff]  ;;  %v507_v34 = vunpack.c.l.s4 %v3534_v33 }
  0x28   :  { %v3035_v3 = vcombine.high %v120_v0, %v124_v1  ;;  %v3034_v5 = vcombine.low %v120_v0, %v124_v1  ;;  %v128_v6 = vld [vmem:[#allocation2 + $0x40] sm:$0xff]  ;;  %v3037_v8 = vcombine.high %v121_v2, %v125_v4  ;;  %v3036_v9 = vcombine.low %v121_v2, %v125_v4  ;;  %v129_v11 = vld [vmem:[#allocation2 + $0x48] sm:$0xff] }
  0x29   :  { %v132_v7 = vld [vmem:[#allocation2 + $0x60] sm:$0xff]  ;;  %v133_v12 = vld [vmem:[#allocation2 + $0x68] sm:$0xff]  ;;  %v3581_v43 = vshrl.u32 %v47_v32, 7  ;;  %v508_v44 = vunpack.c.0.s8 %v507_v34 }
  0x2a   :  { %v3043_v10 = vcombine.high %v128_v6, %v132_v7  ;;  %v136_v13 = vld [vmem:[#allocation2 + $0x80] sm:$0xff]  ;;  %2478 = vmatprep.subr.bf16.mxu0 %v3035_v3  ;;  %v3045_v14 = vcombine.high %v129_v11, %v133_v12  ;;  %v137_v16 = vld [vmem:[#allocation2 + $0x88] sm:$0xff]  ;;  %2601 = vmatprep.subr.bf16.mxu1 %v3037_v8  ;;  %v3042_v18 = vcombine.low %v128_v6, %v132_v7 }
  0x2b   :  { %v140_v15 = vld [vmem:[#allocation2 + $0xa0] sm:$0xff]  ;;  %v141_v17 = vld [vmem:[#allocation2 + $0xa8] sm:$0xff]  ;;  %2479 = vmatpush1.bf16.msra.mxu0 %v3034_v5  ;;  %2602 = vmatpush1.bf16.msra.mxu1 %v3036_v9  ;;  %v3044_v19 = vcombine.low %v129_v11, %v133_v12  ;;  %v3584_v53 = vsub.s32 %v508_v44, %v3581_v43 }
  0x2c   :  { %2480 = vmatprep.subr.bf16.mxu0 %v3043_v10  ;;  %v3051_v20 = vcombine.high %v136_v13, %v140_v15  ;;  %2603 = vmatprep.subr.bf16.mxu1 %v3045_v14  ;;  %v3053_v21 = vcombine.high %v137_v16, %v141_v17  ;;  %v144_v22 = vld [vmem:[#allocation2 + $0xc0] sm:$0xff]  ;;  %v145_v24 = vld [vmem:[#allocation2 + $0xc8] sm:$0xff]  ;;  %v3050_v26 = vcombine.low %v136_v13, %v140_v15 }
  0x2d   :  { %v148_v23 = vld [vmem:[#allocation2 + $0xe0] sm:$0xff]  ;;  %v149_v25 = vld [vmem:[#allocation2 + $0xe8] sm:$0xff]  ;;  %v3052_v27 = vcombine.low %v137_v16, %v141_v17 }
  0x2e   :  { %v3059_v28 = vcombine.high %v144_v22, %v148_v23  ;;  %v3061_v29 = vcombine.high %v145_v24, %v149_v25  ;;  %v152_v30 = vld [vmem:[#allocation2 + $0x100] sm:$0xff]  ;;  %v153_v35 = vld [vmem:[#allocation2 + $0x108] sm:$0xff]  ;;  %v3058_v37 = vcombine.low %v144_v22, %v148_v23  ;;  %v3060_v38 = vcombine.low %v145_v24, %v149_v25 }
  0x2f   :  { %2481 = vmatpush1.bf16.msra.mxu0 %v3042_v18  ;;  %2604 = vmatpush1.bf16.msra.mxu1 %v3044_v19  ;;  %v156_v31 = vld [vmem:[#allocation2 + $0x120] sm:$0xff]  ;;  %v157_v36 = vld [vmem:[#allocation2 + $0x128] sm:$0xff] }
  0x30   :  { %2482 = vmatprep.subr.bf16.mxu0 %v3051_v20  ;;  %2605 = vmatprep.subr.bf16.mxu1 %v3053_v21  ;;  %v3067_v39 = vcombine.high %v152_v30, %v156_v31  ;;  %v3069_v40 = vcombine.high %v153_v35, %v157_v36  ;;  %v160_v41 = vld [vmem:[#allocation2 + $0x140] sm:$0xff]  ;;  %v161_v45 = vld [vmem:[#allocation2 + $0x148] sm:$0xff]  ;;  %v3066_v47 = vcombine.low %v152_v30, %v156_v31 }
  0x31   :  { %v164_v42 = vld [vmem:[#allocation2 + $0x160] sm:$0xff]  ;;  %v165_v46 = vld [vmem:[#allocation2 + $0x168] sm:$0xff]  ;;  %v3068_v48 = vcombine.low %v153_v35, %v157_v36 }
  0x32   :  { %v3075_v49 = vcombine.high %v160_v41, %v164_v42  ;;  %v3077_v50 = vcombine.high %v161_v45, %v165_v46  ;;  %v168_v51 = vld [vmem:[#allocation2 + $0x180] sm:$0xff]  ;;  %v169_v54 = vld [vmem:[#allocation2 + $0x188] sm:$0xff]  ;;  %v3074_v56 = vcombine.low %v160_v41, %v164_v42  ;;  %v3076_v57 = vcombine.low %v161_v45, %v165_v46 }
  0x33   :  { %2483 = vmatpush1.bf16.msra.mxu0 %v3050_v26  ;;  %2606 = vmatpush1.bf16.msra.mxu1 %v3052_v27  ;;  %v172_v52 = vld [vmem:[#allocation2 + $0x1a0] sm:$0xff]  ;;  %v173_v55 = vld [vmem:[#allocation2 + $0x1a8] sm:$0xff] }
  0x34   :  { %2484 = vmatprep.subr.bf16.mxu0 %v3059_v28  ;;  %2607 = vmatprep.subr.bf16.mxu1 %v3061_v29  ;;  %v3083_v58 = vcombine.high %v168_v51, %v172_v52  ;;  %v3589_v59 = vld [vmem:[%s3666_s0] sm:$0x3f]  ;;  %v3085_v60 = vcombine.high %v169_v54, %v173_v55  ;;  %v177_v0 = vld [vmem:[#allocation2 + $0x1c8] sm:$0xff]  ;;  %v3082_v2 = vcombine.low %v168_v51, %v172_v52  ;;  %s3536_s0 = smov [#allocation7]  }
  0x35   :  { %v176_v61 = vld [vmem:[#allocation2 + $0x1c0] sm:$0xff]  ;;  %v3593_v63 = vrot.slane %v3589_v59, %v3584_v53  ;;  %v181_v1 = vld [vmem:[#allocation2 + $0x1e8] sm:$0xff]  ;;  %v3084_v4 = vcombine.low %v169_v54, %v173_v55  ;;  %s3024_s11 = sshll.u32 %s3536_s0, 4  ;;  %s3025_s11 = int_to_ptr.vmem [resolvable:$true] %s3024_s11 }
  0x36   :  { %v180_v62 = vld [vmem:[#allocation2 + $0x1e0] sm:$0xff]  ;;  %v3093_v6 = vcombine.high %v177_v0, %v181_v1  ;;  %v185_v10 = vld [vmem:[#allocation2 + $0x208] sm:$0xff]  ;;  %v3092_v13 = vcombine.low %v177_v0, %v181_v1  ;;  %s3502_s12 = scalar_lea.vmem %s3025_s11, 256  ;;  %p3507_p3 = scmp.lt.s32.totalorder %s3025_s11, %s3025_s11 }
  0x37   :  { %2485 = vmatpush1.bf16.msra.mxu0 %v3058_v37  ;;  %2608 = vmatpush1.bf16.msra.mxu1 %v3060_v38  ;;  %v520_v3 = vcombine.high %v3593_v63, %v3593_v63  ;;  %v3091_v5 = vcombine.high %v176_v61, %v180_v62  ;;  %v184_v7 = vld [vmem:[#allocation2 + $0x200] sm:$0xff]  ;;  %v189_v11 = vld [vmem:[#allocation2 + $0x228] sm:$0xff]  ;;  %v3090_v12 = vcombine.low %v176_v61, %v180_v62  ;;  %p3503_p2 = scmp.ne.s32.totalorder %s3025_s11, %s3502_s12  ;;  %p3508_p4 = scmp.lt.s32.totalorder %s3502_s12, %s3502_s12 }
  0x38   :  { %2486 = vmatprep.subr.bf16.mxu0 %v3067_v39  ;;  %2609 = vmatprep.subr.bf16.mxu1 %v3069_v40  ;;  %v188_v8 = vld [vmem:[#allocation2 + $0x220] sm:$0xff]  ;;  %v3101_v15 = vcombine.high %v185_v10, %v189_v11  ;;  %v193_v18 = vld [vmem:[#allocation2 + $0x248] sm:$0xff]  ;;  %v3100_v21 = vcombine.low %v185_v10, %v189_v11 }
  0x39   :  { %v3598_v9 = vrot.slane %v520_v3, %v3584_v53  ;;  %v3099_v14 = vcombine.high %v184_v7, %v188_v8  ;;  %v192_v16 = vld [vmem:[#allocation2 + $0x240] sm:$0xff]  ;;  %v197_v19 = vld [vmem:[#allocation2 + $0x268] sm:$0xff]  ;;  %v3098_v20 = vcombine.low %v184_v7, %v188_v8  ;;  %p3509_p5 = por %p3508_p4, %p3507_p3 }
  0x3a   :  { %v196_v17 = vld [vmem:[#allocation2 + $0x260] sm:$0xff]  ;;  %v3109_v23 = vcombine.high %v193_v18, %v197_v19  ;;  %v201_v26 = vld [vmem:[#allocation2 + $0x288] sm:$0xff]  ;;  %v3108_v29 = vcombine.low %v193_v18, %v197_v19  ;;  %v505_v18 = vcombine.high %v3589_v59, %v3589_v59 }
  0x3b   :  { %2487 = vmatpush1.bf16.msra.mxu0 %v3066_v47  ;;  %2610 = vmatpush1.bf16.msra.mxu1 %v3068_v48  ;;  %v3107_v22 = vcombine.high %v192_v16, %v196_v17  ;;  %v200_v24 = vld [vmem:[#allocation2 + $0x280] sm:$0xff]  ;;  %v205_v27 = vld [vmem:[#allocation2 + $0x2a8] sm:$0xff]  ;;  %v3106_v28 = vcombine.low %v192_v16, %v196_v17  ;;  %p3510_p6 = pnand %p3509_p5, %p3503_p2 }
  0x3c   :  { %2488 = vmatprep.subr.bf16.mxu0 %v3075_v49  ;;  %2611 = vmatprep.subr.bf16.mxu1 %v3077_v50  ;;  %v204_v25 = vld [vmem:[#allocation2 + $0x2a0] sm:$0xff]  ;;  %v3117_v31 = vcombine.high %v201_v26, %v205_v27  ;;  %v209_v34 = vld [vmem:[#allocation2 + $0x2c8] sm:$0xff]  ;;  %v3116_v37 = vcombine.low %v201_v26, %v205_v27 }
  0x3d   :  { %2510 = vmatprep.mubr.bf16.mxu0 %v3598_v9  ;;  %2633 = vmatprep.mubr.bf16.mxu1 %v3598_v9  ;;  %v3115_v30 = vcombine.high %v200_v24, %v204_v25  ;;  %v208_v32 = vld [vmem:[#allocation2 + $0x2c0] sm:$0xff]  ;;  %v213_v35 = vld [vmem:[#allocation2 + $0x2e8] sm:$0xff]  ;;  %v3114_v36 = vcombine.low %v200_v24, %v204_v25  ;;  %v519_v24 = vrot.slane %v505_v18, %v3584_v53 }
  0x3e   :  { %v212_v33 = vld [vmem:[#allocation2 + $0x2e0] sm:$0xff]  ;;  %v3125_v39 = vcombine.high %v209_v34, %v213_v35  ;;  %v217_v42 = vld [vmem:[#allocation2 + $0x308] sm:$0xff]  ;;  %v3124_v46 = vcombine.low %v209_v34, %v213_v35  ;;  %v3607_v25 = vrot.slane %v3593_v63, %v3584_v53  ;;  %v3614_v63 = vcombine.high %v3598_v9, %v3598_v9 }
  0x3f   :  { %2489 = vmatpush1.bf16.msra.mxu0 %v3074_v56  ;;  %2612 = vmatpush1.bf16.msra.mxu1 %v3076_v57  ;;  %v3123_v38 = vcombine.high %v208_v32, %v212_v33  ;;  %v216_v40 = vld [vmem:[#allocation2 + $0x300] sm:$0xff]  ;;  %v221_v44 = vld [vmem:[#allocation2 + $0x328] sm:$0xff]  ;;  %v3122_v45 = vcombine.low %v208_v32, %v212_v33 }
  0x40   :  { %2490 = vmatprep.subr.bf16.mxu0 %v3083_v58  ;;  %2613 = vmatprep.subr.bf16.mxu1 %v3085_v60  ;;  %v220_v41 = vld [vmem:[#allocation2 + $0x320] sm:$0xff]  ;;  %v3133_v48 = vcombine.high %v217_v42, %v221_v44  ;;  %v225_v51 = vld [vmem:[#allocation2 + $0x348] sm:$0xff]  ;;  %v3132_v55 = vcombine.low %v217_v42, %v221_v44 }
  0x41   :  { %v3131_v47 = vcombine.high %v216_v40, %v220_v41  ;;  %v224_v49 = vld [vmem:[#allocation2 + $0x340] sm:$0xff]  ;;  %v229_v52 = vld [vmem:[#allocation2 + $0x368] sm:$0xff]  ;;  %v3130_v54 = vcombine.low %v216_v40, %v220_v41 }
  0x42   :  { %v228_v50 = vld [vmem:[#allocation2 + $0x360] sm:$0xff]  ;;  %v3141_v57 = vcombine.high %v225_v51, %v229_v52  ;;  %v233_v61 = vld [vmem:[#allocation2 + $0x388] sm:$0xff]  ;;  %v3140_v1 = vcombine.low %v225_v51, %v229_v52 }
  0x43   :  { %2491 = vmatpush1.bf16.msra.mxu0 %v3082_v2  ;;  %2614 = vmatpush1.bf16.msra.mxu1 %v3084_v4  ;;  %v3139_v56 = vcombine.high %v224_v49, %v228_v50  ;;  %v232_v58 = vld [vmem:[#allocation2 + $0x380] sm:$0xff]  ;;  %v237_v62 = vld [vmem:[#allocation2 + $0x3a8] sm:$0xff]  ;;  %v3138_v0 = vcombine.low %v224_v49, %v228_v50 }
  0x44   :  { %2492 = vmatprep.subr.bf16.mxu0 %v3091_v5  ;;  %2615 = vmatprep.subr.bf16.mxu1 %v3093_v6  ;;  %v236_v60 = vld [vmem:[#allocation2 + $0x3a0] sm:$0xff]  ;;  %v3149_v3 = vcombine.high %v233_v61, %v237_v62  ;;  %v241_v6 = vld [vmem:[#allocation2 + $0x3c8] sm:$0xff]  ;;  %v3148_v10 = vcombine.low %v233_v61, %v237_v62 }
  0x45   :  { %v3147_v2 = vcombine.high %v232_v58, %v236_v60  ;;  %v240_v4 = vld [vmem:[#allocation2 + $0x3c0] sm:$0xff]  ;;  %v245_v7 = vld [vmem:[#allocation2 + $0x3e8] sm:$0xff]  ;;  %v3146_v8 = vcombine.low %v232_v58, %v236_v60 }
  0x46   :  { %v244_v5 = vld [vmem:[#allocation2 + $0x3e0] sm:$0xff]  ;;  %v253_v16 = vld [vmem:[#allocation2 + $0x428] sm:$0xff]  ;;  %v3156_v19 = vcombine.low %v241_v6, %v245_v7 }
  0x47   :  { %2493 = vmatpush1.bf16.msra.mxu0 %v3090_v12  ;;  %2616 = vmatpush1.bf16.msra.mxu1 %v3092_v13  ;;  %v3155_v11 = vcombine.high %v240_v4, %v244_v5  ;;  %v3157_v12 = vcombine.high %v241_v6, %v245_v7  ;;  %v248_v13 = vld [vmem:[#allocation2 + $0x400] sm:$0xff]  ;;  %v3154_v17 = vcombine.low %v240_v4, %v244_v5  ;;  %v257_v26 = vld [vmem:[#allocation2 + $0x448] sm:$0xff] }
  0x48   :  { %2494 = vmatprep.subr.bf16.mxu0 %v3099_v14  ;;  %2617 = vmatprep.subr.bf16.mxu1 %v3101_v15  ;;  %v252_v14 = vld [vmem:[#allocation2 + $0x420] sm:$0xff]  ;;  %v249_v15 = vld [vmem:[#allocation2 + $0x408] sm:$0xff] }
  0x49   :  { %v261_v27 = vld [vmem:[#allocation2 + $0x468] sm:$0xff]  ;;  %v3164_v59 = vcombine.low %v249_v15, %v253_v16  ;;  %v264_v33 = vld [vmem:[#allocation2 + $0x480] sm:$0xff] }
  0x4a   :  { %v3173_v32 = vcombine.high %v257_v26, %v261_v27  ;;  %v268_v34 = vld [vmem:[#allocation2 + $0x4a0] sm:$0xff]  ;;  %v281_v52 = vld [vmem:[#allocation2 + $0x508] sm:$0xff] }
  0x4b   :  { %2495 = vmatpush1.bf16.msra.mxu0 %v3098_v20  ;;  %2618 = vmatpush1.bf16.msra.mxu1 %v3100_v21  ;;  %v3163_v20 = vcombine.high %v248_v13, %v252_v14  ;;  %v3165_v21 = vcombine.high %v249_v15, %v253_v16  ;;  %v3179_v40 = vcombine.high %v264_v33, %v268_v34  ;;  %v272_v42 = vld [vmem:[#allocation2 + $0x4c0] sm:$0xff]  ;;  %v289_v62 = vld [vmem:[#allocation2 + $0x548] sm:$0xff] }
  0x4c   :  { %2496 = vmatprep.subr.bf16.mxu0 %v3107_v22  ;;  %2619 = vmatprep.subr.bf16.mxu1 %v3109_v23  ;;  %v256_v22 = vld [vmem:[#allocation2 + $0x440] sm:$0xff]  ;;  %v297_v7 = vld [vmem:[#allocation2 + $0x588] sm:$0xff] }
  0x4d   :  { %v260_v23 = vld [vmem:[#allocation2 + $0x460] sm:$0xff]  ;;  %v305_v16 = vld [vmem:[#allocation2 + $0x5c8] sm:$0xff] }
  0x4e   :  { %v276_v44 = vld [vmem:[#allocation2 + $0x4e0] sm:$0xff] }
  0x4f   :  { %2497 = vmatpush1.bf16.msra.mxu0 %v3106_v28  ;;  %2620 = vmatpush1.bf16.msra.mxu1 %v3108_v29  ;;  %v3162_v28 = vcombine.low %v248_v13, %v252_v14  ;;  %v521_v29 = vcombine.high %v519_v24, %v519_v24  ;;  %v280_v50 = vld [vmem:[#allocation2 + $0x500] sm:$0xff] }
  0x50   :  { %2498 = vmatprep.subr.bf16.mxu0 %v3115_v30  ;;  %2621 = vmatprep.subr.bf16.mxu1 %v3117_v31  ;;  %v3171_v30 = vcombine.high %v256_v22, %v260_v23  ;;  %v3610_v31 = vrot.slane %v519_v24, %v3584_v53  ;;  %v284_v51 = vld [vmem:[#allocation2 + $0x520] sm:$0xff]  ;;  %v313_v24 = vld [vmem:[#allocation2 + $0x608] sm:$0xff] }
  0x51   :  { %v3617_v35 = vrot.slane %v521_v29, %v3584_v53  ;;  %v273_v53 = vld [vmem:[#allocation2 + $0x4c8] sm:$0xff]  ;;  %v288_v60 = vld [vmem:[#allocation2 + $0x540] sm:$0xff] }
  0x52   :  { %v292_v61 = vld [vmem:[#allocation2 + $0x560] sm:$0xff] }
  0x53   :  { %2499 = vmatpush1.bf16.msra.mxu0 %v3114_v36  ;;  %2622 = vmatpush1.bf16.msra.mxu1 %v3116_v37  ;;  %v265_v36 = vld [vmem:[#allocation2 + $0x488] sm:$0xff]  ;;  %v296_v5 = vld [vmem:[#allocation2 + $0x580] sm:$0xff] }
  0x54   :  { %2500 = vmatprep.subr.bf16.mxu0 %v3123_v38  ;;  %2623 = vmatprep.subr.bf16.mxu1 %v3125_v39  ;;  %v269_v37 = vld [vmem:[#allocation2 + $0x4a8] sm:$0xff]  ;;  %v3170_v38 = vcombine.low %v256_v22, %v260_v23  ;;  %v3172_v39 = vcombine.low %v257_v26, %v261_v27  ;;  %v300_v6 = vld [vmem:[#allocation2 + $0x5a0] sm:$0xff] }
  0x55   :  { %v3181_v41 = vcombine.high %v265_v36, %v269_v37  ;;  %v304_v14 = vld [vmem:[#allocation2 + $0x5c0] sm:$0xff]  ;;  %v3210_v18 = vcombine.low %v296_v5, %v300_v6  ;;  %v317_v26 = vld [vmem:[#allocation2 + $0x628] sm:$0xff] }
  0x56   :  { %v308_v15 = vld [vmem:[#allocation2 + $0x5e0] sm:$0xff] }
  0x57   :  { %2501 = vmatpush1.bf16.msra.mxu0 %v3122_v45  ;;  %2624 = vmatpush1.bf16.msra.mxu1 %v3124_v46  ;;  %v277_v45 = vld [vmem:[#allocation2 + $0x4e8] sm:$0xff]  ;;  %v3178_v46 = vcombine.low %v264_v33, %v268_v34  ;;  %v312_v22 = vld [vmem:[#allocation2 + $0x600] sm:$0xff]  ;;  %v3218_v27 = vcombine.low %v304_v14, %v308_v15 }
  0x58   :  { %2502 = vmatprep.subr.bf16.mxu0 %v3131_v47  ;;  %2625 = vmatprep.subr.bf16.mxu1 %v3133_v48  ;;  %v3180_v47 = vcombine.low %v265_v36, %v269_v37  ;;  %v3187_v48 = vcombine.high %v272_v42, %v276_v44  ;;  %v3189_v49 = vcombine.high %v273_v53, %v277_v45  ;;  %v316_v23 = vld [vmem:[#allocation2 + $0x620] sm:$0xff]  ;;  %v321_v33 = vld [vmem:[#allocation2 + $0x648] sm:$0xff] }
  0x59   :  { %v3227_v29 = vcombine.high %v312_v22, %v316_v23  ;;  %v325_v34 = vld [vmem:[#allocation2 + $0x668] sm:$0xff]  ;;  %v3226_v36 = vcombine.low %v312_v22, %v316_v23  ;;  %v3228_v37 = vcombine.low %v313_v24, %v317_v26 }
  0x5a   :  { %v369_v22 = vld [vmem:[#allocation2 + $0x7c8] sm:$0xff] }
  0x5b   :  { %2503 = vmatpush1.bf16.msra.mxu0 %v3130_v54  ;;  %2626 = vmatpush1.bf16.msra.mxu1 %v3132_v55  ;;  %v285_v54 = vld [vmem:[#allocation2 + $0x528] sm:$0xff]  ;;  %v3186_v55 = vcombine.low %v272_v42, %v276_v44 }
  0x5c   :  { %2504 = vmatprep.subr.bf16.mxu0 %v3139_v56  ;;  %2627 = vmatprep.subr.bf16.mxu1 %v3141_v57  ;;  %v3188_v56 = vcombine.low %v273_v53, %v277_v45  ;;  %v3195_v57 = vcombine.high %v280_v50, %v284_v51  ;;  %v3197_v58 = vcombine.high %v281_v52, %v285_v54  ;;  %v329_v42 = vld [vmem:[#allocation2 + $0x688] sm:$0xff] }
  0x5d   :  { %v333_v44 = vld [vmem:[#allocation2 + $0x6a8] sm:$0xff]  ;;  %v3236_v45 = vcombine.low %v321_v33, %v325_v34 }
  0x5e   :  { %v373_v23 = vld [vmem:[#allocation2 + $0x7e8] sm:$0xff] }
  0x5f   :  { %2505 = vmatpush1.bf16.msra.mxu0 %v3138_v0  ;;  %2628 = vmatpush1.bf16.msra.mxu1 %v3140_v1  ;;  %v293_v0 = vld [vmem:[#allocation2 + $0x568] sm:$0xff]  ;;  %v3194_v1 = vcombine.low %v280_v50, %v284_v51 }
  0x60   :  { %2506 = vmatprep.subr.bf16.mxu0 %v3147_v2  ;;  %2629 = vmatprep.subr.bf16.mxu1 %v3149_v3  ;;  %v3196_v2 = vcombine.low %v281_v52, %v285_v54  ;;  %v3203_v3 = vcombine.high %v288_v60, %v292_v61  ;;  %v3205_v4 = vcombine.high %v289_v62, %v293_v0  ;;  %v337_v50 = vld [vmem:[#allocation2 + $0x6c8] sm:$0xff] }
  0x61   :  { %v341_v51 = vld [vmem:[#allocation2 + $0x6e8] sm:$0xff]  ;;  %v3244_v54 = vcombine.low %v329_v42, %v333_v44 }
  0x63   :  { %2507 = vmatpush1.bf16.msra.mxu0 %v3146_v8  ;;  %2630 = vmatpush1.bf16.msra.mxu1 %v3148_v10  ;;  %v301_v8 = vld [vmem:[#allocation2 + $0x5a8] sm:$0xff]  ;;  %v3202_v10 = vcombine.low %v288_v60, %v292_v61 }
  0x64   :  { %2508 = vmatprep.subr.bf16.mxu0 %v3155_v11  ;;  %2631 = vmatprep.subr.bf16.mxu1 %v3157_v12  ;;  %v3204_v11 = vcombine.low %v289_v62, %v293_v0  ;;  %v3211_v12 = vcombine.high %v296_v5, %v300_v6  ;;  %v3213_v13 = vcombine.high %v297_v7, %v301_v8  ;;  %v345_v60 = vld [vmem:[#allocation2 + $0x708] sm:$0xff] }
  0x65   :  { %v349_v61 = vld [vmem:[#allocation2 + $0x728] sm:$0xff]  ;;  %v3252_v0 = vcombine.low %v337_v50, %v341_v51 }
  0x66   :  { %v353_v5 = vld [vmem:[#allocation2 + $0x748] sm:$0xff] }
  0x67   :  { %2509 = vmatpush1.bf16.msra.mxu0 %v3154_v17  ;;  %2632 = vmatpush1.bf16.msra.mxu1 %v3156_v19  ;;  %v309_v17 = vld [vmem:[#allocation2 + $0x5e8] sm:$0xff]  ;;  %v3212_v19 = vcombine.low %v297_v7, %v301_v8  ;;  %v3260_v8 = vcombine.low %v345_v60, %v349_v61 }
  0x68   :  { %2519 = vmatprep.subr.bf16.mxu0 %v3163_v20  ;;  %2642 = vmatprep.subr.bf16.mxu1 %v3165_v21  ;;  %v3219_v20 = vcombine.high %v304_v14, %v308_v15  ;;  %v3221_v21 = vcombine.high %v305_v16, %v309_v17  ;;  %v357_v6 = vld [vmem:[#allocation2 + $0x768] sm:$0xff] }
  0x69   :  { %v361_v14 = vld [vmem:[#allocation2 + $0x788] sm:$0xff] }
  0x6a   :  { %2511 = vmatmul.mubr.bf16.vlgmr.msra.gmra.mrb[0].mxu0 %v3607_v25  ;;  %2634 = vmatmul.mubr.bf16.vlgmr.msra.gmra.mrb[0].mxu1 %v3607_v25  ;;  %v365_v15 = vld [vmem:[#allocation2 + $0x7a8] sm:$0xff] }
  0x6b   :  { %2520 = vmatpush1.bf16.msra.mxu0 %v3162_v28  ;;  %2643 = vmatpush1.bf16.msra.mxu1 %v3164_v59  ;;  %v3220_v28 = vcombine.low %v305_v16, %v309_v17  ;;  %v3229_v59 = vcombine.high %v313_v24, %v317_v26  ;;  %v3268_v17 = vcombine.low %v353_v5, %v357_v6 }
  0x6c   :  { %2521 = vmatprep.subr.bf16.mxu0 %v3171_v30  ;;  %2644 = vmatprep.subr.bf16.mxu1 %v3173_v32  ;;  %v320_v30 = vld [vmem:[#allocation2 + $0x640] sm:$0xff]  ;;  %v3276_v26 = vcombine.low %v361_v14, %v365_v15 }
  0x6d   :  { %2551 = vmatprep.mubr.bf16.mxu0 %v3614_v63  ;;  %2674 = vmatprep.mubr.bf16.mxu1 %v3614_v63  ;;  %v324_v32 = vld [vmem:[#allocation2 + $0x660] sm:$0xff] }
  0x6e   :  { %v3234_v53 = vcombine.low %v320_v30, %v324_v32 }
  0x6f   :  { %2522 = vmatpush1.bf16.msra.mxu0 %v3170_v38  ;;  %2645 = vmatpush1.bf16.msra.mxu1 %v3172_v39  ;;  %v3235_v38 = vcombine.high %v320_v30, %v324_v32  ;;  %v3237_v39 = vcombine.high %v321_v33, %v325_v34  ;;  %v377_v30 = vld [vmem:[#allocation2 + $0x808] sm:$0xff]  ;;  %v3284_v34 = vcombine.low %v369_v22, %v373_v23 }
  0x70   :  { %2523 = vmatprep.subr.bf16.mxu0 %v3179_v40  ;;  %2646 = vmatprep.subr.bf16.mxu1 %v3181_v41  ;;  %v328_v40 = vld [vmem:[#allocation2 + $0x680] sm:$0xff]  ;;  %v381_v32 = vld [vmem:[#allocation2 + $0x828] sm:$0xff] }
  0x71   :  { %v332_v41 = vld [vmem:[#allocation2 + $0x6a0] sm:$0xff] }
  0x72   :  { %v3242_v52 = vcombine.low %v328_v40, %v332_v41 }
  0x73   :  { %2524 = vmatpush1.bf16.msra.mxu0 %v3178_v46  ;;  %2647 = vmatpush1.bf16.msra.mxu1 %v3180_v47  ;;  %v3243_v46 = vcombine.high %v328_v40, %v332_v41  ;;  %v3245_v47 = vcombine.high %v329_v42, %v333_v44  ;;  %v3625_v40 = vcombine.high %v3607_v25, %v3607_v25  ;;  %v385_v41 = vld [vmem:[#allocation2 + $0x848] sm:$0xff] }
  0x74   :  { %2525 = vmatprep.subr.bf16.mxu0 %v3187_v48  ;;  %2648 = vmatprep.subr.bf16.mxu1 %v3189_v49  ;;  %v336_v48 = vld [vmem:[#allocation2 + $0x6c0] sm:$0xff]  ;;  %v389_v42 = vld [vmem:[#allocation2 + $0x868] sm:$0xff] }
  0x75   :  { %v340_v49 = vld [vmem:[#allocation2 + $0x6e0] sm:$0xff] }
  0x76   :  { %v3250_v62 = vcombine.low %v336_v48, %v340_v49 }
  0x77   :  { %2526 = vmatpush1.bf16.msra.mxu0 %v3186_v55  ;;  %2649 = vmatpush1.bf16.msra.mxu1 %v3188_v56  ;;  %v3251_v55 = vcombine.high %v336_v48, %v340_v49  ;;  %v3253_v56 = vcombine.high %v337_v50, %v341_v51  ;;  %v396_v48 = vld [vmem:[#allocation2 + $0x8a0] sm:$0xff]  ;;  %v393_v49 = vld [vmem:[#allocation2 + $0x888] sm:$0xff] }
  0x78   :  { %2527 = vmatprep.subr.bf16.mxu0 %v3195_v57  ;;  %2650 = vmatprep.subr.bf16.mxu1 %v3197_v58  ;;  %v344_v57 = vld [vmem:[#allocation2 + $0x700] sm:$0xff]  ;;  %v397_v50 = vld [vmem:[#allocation2 + $0x8a8] sm:$0xff] }
  0x79   :  { %v348_v58 = vld [vmem:[#allocation2 + $0x720] sm:$0xff] }
  0x7a   :  { %v3258_v7 = vcombine.low %v344_v57, %v348_v58 }
  0x7b   :  { %2528 = vmatpush1.bf16.msra.mxu0 %v3194_v1  ;;  %2651 = vmatpush1.bf16.msra.mxu1 %v3196_v2  ;;  %v3259_v1 = vcombine.high %v344_v57, %v348_v58  ;;  %v3261_v2 = vcombine.high %v345_v60, %v349_v61  ;;  %v404_v57 = vld [vmem:[#allocation2 + $0x8e0] sm:$0xff]  ;;  %v401_v58 = vld [vmem:[#allocation2 + $0x8c8] sm:$0xff] }
  0x7c   :  { %2529 = vmatprep.subr.bf16.mxu0 %v3203_v3  ;;  %2652 = vmatprep.subr.bf16.mxu1 %v3205_v4  ;;  %v352_v3 = vld [vmem:[#allocation2 + $0x740] sm:$0xff]  ;;  %v405_v60 = vld [vmem:[#allocation2 + $0x8e8] sm:$0xff] }
  0x7d   :  { %v356_v4 = vld [vmem:[#allocation2 + $0x760] sm:$0xff] }
  0x7e   :  { %v3266_v16 = vcombine.low %v352_v3, %v356_v4 }
  0x7f   :  { %2530 = vmatpush1.bf16.msra.mxu0 %v3202_v10  ;;  %2653 = vmatpush1.bf16.msra.mxu1 %v3204_v11  ;;  %v3267_v10 = vcombine.high %v352_v3, %v356_v4  ;;  %v3269_v11 = vcombine.high %v353_v5, %v357_v6  ;;  %v412_v3 = vld [vmem:[#allocation2 + $0x920] sm:$0xff]  ;;  %v409_v4 = vld [vmem:[#allocation2 + $0x908] sm:$0xff] }
  0x80   :  { %2531 = vmatprep.subr.bf16.mxu0 %v3211_v12  ;;  %2654 = vmatprep.subr.bf16.mxu1 %v3213_v13  ;;  %v360_v12 = vld [vmem:[#allocation2 + $0x780] sm:$0xff]  ;;  %v413_v5 = vld [vmem:[#allocation2 + $0x928] sm:$0xff] }
  0x81   :  { %v364_v13 = vld [vmem:[#allocation2 + $0x7a0] sm:$0xff] }
  0x82   :  { %v3274_v24 = vcombine.low %v360_v12, %v364_v13 }
  0x83   :  { %2532 = vmatpush1.bf16.msra.mxu0 %v3210_v18  ;;  %2655 = vmatpush1.bf16.msra.mxu1 %v3212_v19  ;;  %v3275_v18 = vcombine.high %v360_v12, %v364_v13  ;;  %v3277_v19 = vcombine.high %v361_v14, %v365_v15  ;;  %v420_v12 = vld [vmem:[#allocation2 + $0x960] sm:$0xff]  ;;  %v417_v13 = vld [vmem:[#allocation2 + $0x948] sm:$0xff] }
  0x84   :  { %2533 = vmatprep.subr.bf16.mxu0 %v3219_v20  ;;  %2656 = vmatprep.subr.bf16.mxu1 %v3221_v21  ;;  %v368_v20 = vld [vmem:[#allocation2 + $0x7c0] sm:$0xff]  ;;  %v421_v14 = vld [vmem:[#allocation2 + $0x968] sm:$0xff] }
  0x85   :  { %v372_v21 = vld [vmem:[#allocation2 + $0x7e0] sm:$0xff] }
  0x86   :  { %v3282_v33 = vcombine.low %v368_v20, %v372_v21 }
  0x87   :  { %2534 = vmatpush1.bf16.msra.mxu0 %v3218_v27  ;;  %2657 = vmatpush1.bf16.msra.mxu1 %v3220_v28  ;;  %v3283_v27 = vcombine.high %v368_v20, %v372_v21  ;;  %v3285_v28 = vcombine.high %v369_v22, %v373_v23  ;;  %v428_v20 = vld [vmem:[#allocation2 + $0x9a0] sm:$0xff]  ;;  %v425_v21 = vld [vmem:[#allocation2 + $0x988] sm:$0xff] }
  0x88   :  { %2535 = vmatprep.subr.bf16.mxu0 %v3227_v29  ;;  %2658 = vmatprep.subr.bf16.mxu1 %v3229_v59  ;;  %v376_v29 = vld [vmem:[#allocation2 + $0x800] sm:$0xff]  ;;  %v429_v22 = vld [vmem:[#allocation2 + $0x9a8] sm:$0xff] }
  0x89   :  { %v380_v59 = vld [vmem:[#allocation2 + $0x820] sm:$0xff] }
  0x8a   :  { %v3290_v44 = vcombine.low %v376_v29, %v380_v59 }
  0x8b   :  { %2536 = vmatpush1.bf16.msra.mxu0 %v3226_v36  ;;  %2659 = vmatpush1.bf16.msra.mxu1 %v3228_v37  ;;  %v3291_v36 = vcombine.high %v376_v29, %v380_v59  ;;  %v3293_v37 = vcombine.high %v377_v30, %v381_v32  ;;  %v436_v29 = vld [vmem:[#allocation2 + $0x9e0] sm:$0xff]  ;;  %v433_v59 = vld [vmem:[#allocation2 + $0x9c8] sm:$0xff] }
  0x8c   :  { %2537 = vmatprep.subr.bf16.mxu0 %v3235_v38  ;;  %2660 = vmatprep.subr.bf16.mxu1 %v3237_v39  ;;  %v384_v38 = vld [vmem:[#allocation2 + $0x840] sm:$0xff] }
  0x8d   :  { %v388_v39 = vld [vmem:[#allocation2 + $0x860] sm:$0xff] }
  0x8e   :  { %v3298_v51 = vcombine.low %v384_v38, %v388_v39 }
  0x8f   :  { %2538 = vmatpush1.bf16.msra.mxu0 %v3234_v53  ;;  %2661 = vmatpush1.bf16.msra.mxu1 %v3236_v45  ;;  %v3292_v53 = vcombine.low %v377_v30, %v381_v32  ;;  %v3299_v45 = vcombine.high %v384_v38, %v388_v39  ;;  %v437_v30 = vld [vmem:[#allocation2 + $0x9e8] sm:$0xff]  ;;  %v444_v38 = vld [vmem:[#allocation2 + $0xa20] sm:$0xff] }
  0x90   :  { %2539 = vmatprep.subr.bf16.mxu0 %v3243_v46  ;;  %2662 = vmatprep.subr.bf16.mxu1 %v3245_v47  ;;  %v3301_v46 = vcombine.high %v385_v41, %v389_v42  ;;  %v392_v47 = vld [vmem:[#allocation2 + $0x880] sm:$0xff]  ;;  %v441_v39 = vld [vmem:[#allocation2 + $0xa08] sm:$0xff] }
  0x91   :  { %v3306_v61 = vcombine.low %v392_v47, %v396_v48 }
  0x93   :  { %2540 = vmatpush1.bf16.msra.mxu0 %v3242_v52  ;;  %2663 = vmatpush1.bf16.msra.mxu1 %v3244_v54  ;;  %v3300_v52 = vcombine.low %v385_v41, %v389_v42  ;;  %v3307_v54 = vcombine.high %v392_v47, %v396_v48  ;;  %v445_v41 = vld [vmem:[#allocation2 + $0xa28] sm:$0xff]  ;;  %v452_v47 = vld [vmem:[#allocation2 + $0xa60] sm:$0xff] }
  0x94   :  { %2541 = vmatprep.subr.bf16.mxu0 %v3251_v55  ;;  %2664 = vmatprep.subr.bf16.mxu1 %v3253_v56  ;;  %v3309_v55 = vcombine.high %v393_v49, %v397_v50  ;;  %v400_v56 = vld [vmem:[#allocation2 + $0x8c0] sm:$0xff]  ;;  %v449_v48 = vld [vmem:[#allocation2 + $0xa48] sm:$0xff] }
  0x95   :  { %v3314_v6 = vcombine.low %v400_v56, %v404_v57 }
  0x97   :  { %2542 = vmatpush1.bf16.msra.mxu0 %v3250_v62  ;;  %2665 = vmatpush1.bf16.msra.mxu1 %v3252_v0  ;;  %v3308_v62 = vcombine.low %v393_v49, %v397_v50  ;;  %v3315_v0 = vcombine.high %v400_v56, %v404_v57  ;;  %v453_v49 = vld [vmem:[#allocation2 + $0xa68] sm:$0xff]  ;;  %v460_v56 = vld [vmem:[#allocation2 + $0xaa0] sm:$0xff] }
  0x98   :  { %2543 = vmatprep.subr.bf16.mxu0 %v3259_v1  ;;  %2666 = vmatprep.subr.bf16.mxu1 %v3261_v2  ;;  %v3317_v1 = vcombine.high %v401_v58, %v405_v60  ;;  %v408_v2 = vld [vmem:[#allocation2 + $0x900] sm:$0xff]  ;;  %v457_v57 = vld [vmem:[#allocation2 + $0xa88] sm:$0xff] }
  0x99   :  { %v3322_v15 = vcombine.low %v408_v2, %v412_v3 }
  0x9b   :  { %2544 = vmatpush1.bf16.msra.mxu0 %v3258_v7  ;;  %2667 = vmatpush1.bf16.msra.mxu1 %v3260_v8  ;;  %v3316_v7 = vcombine.low %v401_v58, %v405_v60  ;;  %v3323_v8 = vcombine.high %v408_v2, %v412_v3  ;;  %v461_v58 = vld [vmem:[#allocation2 + $0xaa8] sm:$0xff]  ;;  %v468_v2 = vld [vmem:[#allocation2 + $0xae0] sm:$0xff] }
  0x9c   :  { %2545 = vmatprep.subr.bf16.mxu0 %v3267_v10  ;;  %2668 = vmatprep.subr.bf16.mxu1 %v3269_v11  ;;  %v3325_v10 = vcombine.high %v409_v4, %v413_v5  ;;  %v416_v11 = vld [vmem:[#allocation2 + $0x940] sm:$0xff]  ;;  %v465_v3 = vld [vmem:[#allocation2 + $0xac8] sm:$0xff] }
  0x9d   :  { %v3330_v23 = vcombine.low %v416_v11, %v420_v12 }
  0x9f   :  { %2546 = vmatpush1.bf16.msra.mxu0 %v3266_v16  ;;  %2669 = vmatpush1.bf16.msra.mxu1 %v3268_v17  ;;  %v3324_v16 = vcombine.low %v409_v4, %v413_v5  ;;  %v3331_v17 = vcombine.high %v416_v11, %v420_v12  ;;  %v469_v4 = vld [vmem:[#allocation2 + $0xae8] sm:$0xff]  ;;  %v476_v11 = vld [vmem:[#allocation2 + $0xb20] sm:$0xff] }
  0xa0   :  { %2547 = vmatprep.subr.bf16.mxu0 %v3275_v18  ;;  %2670 = vmatprep.subr.bf16.mxu1 %v3277_v19  ;;  %v3333_v18 = vcombine.high %v417_v13, %v421_v14  ;;  %v424_v19 = vld [vmem:[#allocation2 + $0x980] sm:$0xff]  ;;  %v473_v12 = vld [vmem:[#allocation2 + $0xb08] sm:$0xff] }
  0xa1   :  { %v3338_v32 = vcombine.low %v424_v19, %v428_v20 }
  0xa3   :  { %2548 = vmatpush1.bf16.msra.mxu0 %v3274_v24  ;;  %2671 = vmatpush1.bf16.msra.mxu1 %v3276_v26  ;;  %v3332_v24 = vcombine.low %v417_v13, %v421_v14  ;;  %v3339_v26 = vcombine.high %v424_v19, %v428_v20  ;;  %v477_v13 = vld [vmem:[#allocation2 + $0xb28] sm:$0xff]  ;;  %v484_v19 = vld [vmem:[#allocation2 + $0xb60] sm:$0xff] }
  0xa4   :  { %2549 = vmatprep.subr.bf16.mxu0 %v3283_v27  ;;  %2672 = vmatprep.subr.bf16.mxu1 %v3285_v28  ;;  %v3341_v27 = vcombine.high %v425_v21, %v429_v22  ;;  %v432_v28 = vld [vmem:[#allocation2 + $0x9c0] sm:$0xff]  ;;  %v481_v20 = vld [vmem:[#allocation2 + $0xb48] sm:$0xff] }
  0xa5   :  { %v3346_v42 = vcombine.low %v432_v28, %v436_v29 }
  0xa7   :  { %2550 = vmatpush1.bf16.msra.mxu0 %v3282_v33  ;;  %2673 = vmatpush1.bf16.msra.mxu1 %v3284_v34  ;;  %v3340_v33 = vcombine.low %v425_v21, %v429_v22  ;;  %v3347_v34 = vcombine.high %v432_v28, %v436_v29  ;;  %v485_v21 = vld [vmem:[#allocation2 + $0xb68] sm:$0xff]  ;;  %v492_v28 = vld [vmem:[#allocation2 + $0xba0] sm:$0xff] }
  0xa8   :  { %2560 = vmatprep.subr.bf16.mxu0 %v3291_v36  ;;  %2683 = vmatprep.subr.bf16.mxu1 %v3293_v37  ;;  %v3349_v36 = vcombine.high %v433_v59, %v437_v30  ;;  %v440_v37 = vld [vmem:[#allocation2 + $0xa00] sm:$0xff]  ;;  %v489_v29 = vld [vmem:[#allocation2 + $0xb88] sm:$0xff] }
  0xa9   :  { %v3354_v50 = vcombine.low %v440_v37, %v444_v38 }
  0xaa   :  { %2552 = vmatmul.mubr.bf16.vlgmr.msra.gmra.mrb[0].mxu0 %v3625_v40  ;;  %2675 = vmatmul.mubr.bf16.vlgmr.msra.gmra.mrb[0].mxu1 %v3625_v40 }
  0xab   :  { %2561 = vmatpush1.bf16.msra.mxu0 %v3290_v44  ;;  %2684 = vmatpush1.bf16.msra.mxu1 %v3292_v53  ;;  %v3348_v44 = vcombine.low %v433_v59, %v437_v30  ;;  %v3355_v53 = vcombine.high %v440_v37, %v444_v38  ;;  %v493_v59 = vld [vmem:[#allocation2 + $0xba8] sm:$0xff]  ;;  %v500_v37 = vld [vmem:[#allocation2 + $0xbe0] sm:$0xff] }
  0xac   :  { %2562 = vmatprep.subr.bf16.mxu0 %v3299_v45  ;;  %2685 = vmatprep.subr.bf16.mxu1 %v3301_v46  ;;  %v3357_v45 = vcombine.high %v441_v39, %v445_v41  ;;  %v448_v46 = vld [vmem:[#allocation2 + $0xa40] sm:$0xff]  ;;  %v497_v38 = vld [vmem:[#allocation2 + $0xbc8] sm:$0xff] }
  0xad   :  { %2592 = vmatprep.mubr.bf16.mxu0 %v3617_v35  ;;  %2715 = vmatprep.mubr.bf16.mxu1 %v3617_v35  ;;  %v3362_v60 = vcombine.low %v448_v46, %v452_v47 }
  0xaf   :  { %2563 = vmatpush1.bf16.msra.mxu0 %v3298_v51  ;;  %2686 = vmatpush1.bf16.msra.mxu1 %v3300_v52  ;;  %v3356_v51 = vcombine.low %v441_v39, %v445_v41  ;;  %v3363_v52 = vcombine.high %v448_v46, %v452_v47  ;;  %v501_v39 = vld [vmem:[#allocation2 + $0xbe8] sm:$0xff]  ;;  %v126_v46 = vld [vmem:[#allocation2 + $0x30] sm:$0xff]  ;;  %v123_v47 = vld [vmem:[#allocation2 + $0x18] sm:$0xff] }
  0xb0   :  { %2564 = vmatprep.subr.bf16.mxu0 %v3307_v54  ;;  %2687 = vmatprep.subr.bf16.mxu1 %v3309_v55  ;;  %v3365_v54 = vcombine.high %v449_v48, %v453_v49  ;;  %v456_v55 = vld [vmem:[#allocation2 + $0xa80] sm:$0xff] }
  0xb1   :  { %v3370_v5 = vcombine.low %v456_v55, %v460_v56 }
  0xb3   :  { %2565 = vmatpush1.bf16.msra.mxu0 %v3306_v61  ;;  %2688 = vmatpush1.bf16.msra.mxu1 %v3308_v62  ;;  %v3364_v61 = vcombine.low %v449_v48, %v453_v49  ;;  %v3371_v62 = vcombine.high %v456_v55, %v460_v56  ;;  %v127_v48 = vld [vmem:[#allocation2 + $0x38] sm:$0xff]  ;;  %v134_v55 = vld [vmem:[#allocation2 + $0x70] sm:$0xff] }
  0xb4   :  { %2566 = vmatprep.subr.bf16.mxu0 %v3315_v0  ;;  %2689 = vmatprep.subr.bf16.mxu1 %v3317_v1  ;;  %v3373_v0 = vcombine.high %v457_v57, %v461_v58  ;;  %v464_v1 = vld [vmem:[#allocation2 + $0xac0] sm:$0xff]  ;;  %v131_v56 = vld [vmem:[#allocation2 + $0x58] sm:$0xff] }
  0xb5   :  { %v3378_v14 = vcombine.low %v464_v1, %v468_v2 }
  0xb7   :  { %2567 = vmatpush1.bf16.msra.mxu0 %v3314_v6  ;;  %2690 = vmatpush1.bf16.msra.mxu1 %v3316_v7  ;;  %v3372_v6 = vcombine.low %v457_v57, %v461_v58  ;;  %v3379_v7 = vcombine.high %v464_v1, %v468_v2  ;;  %v135_v57 = vld [vmem:[#allocation2 + $0x78] sm:$0xff]  ;;  %v142_v1 = vld [vmem:[#allocation2 + $0xb0] sm:$0xff] }
  0xb8   :  { %2568 = vmatprep.subr.bf16.mxu0 %v3323_v8  ;;  %2691 = vmatprep.subr.bf16.mxu1 %v3325_v10  ;;  %v3381_v8 = vcombine.high %v465_v3, %v469_v4  ;;  %v472_v10 = vld [vmem:[#allocation2 + $0xb00] sm:$0xff]  ;;  %v139_v2 = vld [vmem:[#allocation2 + $0x98] sm:$0xff] }
  0xb9   :  { %v3386_v22 = vcombine.low %v472_v10, %v476_v11 }
  0xbb   :  { %2569 = vmatpush1.bf16.msra.mxu0 %v3322_v15  ;;  %2692 = vmatpush1.bf16.msra.mxu1 %v3324_v16  ;;  %v3380_v15 = vcombine.low %v465_v3, %v469_v4  ;;  %v3387_v16 = vcombine.high %v472_v10, %v476_v11  ;;  %v143_v3 = vld [vmem:[#allocation2 + $0xb8] sm:$0xff]  ;;  %v150_v10 = vld [vmem:[#allocation2 + $0xf0] sm:$0xff] }
  0xbc   :  { %2570 = vmatprep.subr.bf16.mxu0 %v3331_v17  ;;  %2693 = vmatprep.subr.bf16.mxu1 %v3333_v18  ;;  %v3389_v17 = vcombine.high %v473_v12, %v477_v13  ;;  %v480_v18 = vld [vmem:[#allocation2 + $0xb40] sm:$0xff]  ;;  %v147_v11 = vld [vmem:[#allocation2 + $0xd8] sm:$0xff] }
  0xbd   :  { %v3394_v30 = vcombine.low %v480_v18, %v484_v19 }
  0xbf   :  { %2571 = vmatpush1.bf16.msra.mxu0 %v3330_v23  ;;  %2694 = vmatpush1.bf16.msra.mxu1 %v3332_v24  ;;  %v3388_v23 = vcombine.low %v473_v12, %v477_v13  ;;  %v3395_v24 = vcombine.high %v480_v18, %v484_v19  ;;  %v151_v12 = vld [vmem:[#allocation2 + $0xf8] sm:$0xff]  ;;  %v158_v18 = vld [vmem:[#allocation2 + $0x130] sm:$0xff] }
  0xc0   :  { %2572 = vmatprep.subr.bf16.mxu0 %v3339_v26  ;;  %2695 = vmatprep.subr.bf16.mxu1 %v3341_v27  ;;  %v3397_v26 = vcombine.high %v481_v20, %v485_v21  ;;  %v488_v27 = vld [vmem:[#allocation2 + $0xb80] sm:$0xff]  ;;  %v155_v19 = vld [vmem:[#allocation2 + $0x118] sm:$0xff] }
  0xc1   :  { %v3402_v41 = vcombine.low %v488_v27, %v492_v28 }
  0xc3   :  { %2573 = vmatpush1.bf16.msra.mxu0 %v3338_v32  ;;  %2696 = vmatpush1.bf16.msra.mxu1 %v3340_v33  ;;  %v3396_v32 = vcombine.low %v481_v20, %v485_v21  ;;  %v3403_v33 = vcombine.high %v488_v27, %v492_v28  ;;  %v159_v20 = vld [vmem:[#allocation2 + $0x138] sm:$0xff] }
  0xc4   :  { %2574 = vmatprep.subr.bf16.mxu0 %v3347_v34  ;;  %2697 = vmatprep.subr.bf16.mxu1 %v3349_v36  ;;  %v3405_v34 = vcombine.high %v489_v29, %v493_v59  ;;  %v496_v36 = vld [vmem:[#allocation2 + $0xbc0] sm:$0xff]  ;;  %v163_v27 = vld [vmem:[#allocation2 + $0x158] sm:$0xff] }
  0xc5   :  { %v3410_v49 = vcombine.low %v496_v36, %v500_v37  ;;  %v167_v28 = vld [vmem:[#allocation2 + $0x178] sm:$0xff] }
  0xc7   :  { %2575 = vmatpush1.bf16.msra.mxu0 %v3346_v42  ;;  %2698 = vmatpush1.bf16.msra.mxu1 %v3348_v44  ;;  %v3404_v42 = vcombine.low %v489_v29, %v493_v59  ;;  %v3411_v44 = vcombine.high %v496_v36, %v500_v37  ;;  %v3072_v59 = vcombine.low %v155_v19, %v159_v20  ;;  %v171_v36 = vld [vmem:[#allocation2 + $0x198] sm:$0xff] }
  0xc8   :  { %2576 = vmatprep.subr.bf16.mxu0 %v3355_v53  ;;  %2699 = vmatprep.subr.bf16.mxu1 %v3357_v45  ;;  %v3413_v53 = vcombine.high %v497_v38, %v501_v39  ;;  %v122_v45 = vld [vmem:[#allocation2 + $0x10] sm:$0xff]  ;;  %v175_v37 = vld [vmem:[#allocation2 + $0x1b8] sm:$0xff] }
  0xc9   :  { %v3038_v58 = vcombine.low %v122_v45, %v126_v46 }
  0xcb   :  { %2577 = vmatpush1.bf16.msra.mxu0 %v3354_v50  ;;  %2700 = vmatpush1.bf16.msra.mxu1 %v3356_v51  ;;  %v3412_v50 = vcombine.low %v497_v38, %v501_v39  ;;  %v3039_v51 = vcombine.high %v122_v45, %v126_v46  ;;  %v3080_v39 = vcombine.low %v163_v27, %v167_v28  ;;  %v179_v45 = vld [vmem:[#allocation2 + $0x1d8] sm:$0xff] }
  0xcc   :  { %2578 = vmatprep.subr.bf16.mxu0 %v3363_v52  ;;  %2701 = vmatprep.subr.bf16.mxu1 %v3365_v54  ;;  %v3041_v52 = vcombine.high %v123_v47, %v127_v48  ;;  %v130_v54 = vld [vmem:[#allocation2 + $0x50] sm:$0xff]  ;;  %v183_v46 = vld [vmem:[#allocation2 + $0x1f8] sm:$0xff] }
  0xcd   :  { %v3046_v4 = vcombine.low %v130_v54, %v134_v55 }
  0xcf   :  { %2579 = vmatpush1.bf16.msra.mxu0 %v3362_v60  ;;  %2702 = vmatpush1.bf16.msra.mxu1 %v3364_v61  ;;  %v3040_v60 = vcombine.low %v123_v47, %v127_v48  ;;  %v3047_v61 = vcombine.high %v130_v54, %v134_v55  ;;  %v3088_v48 = vcombine.low %v171_v36, %v175_v37  ;;  %v187_v54 = vld [vmem:[#allocation2 + $0x218] sm:$0xff] }
  0xd0   :  { %2580 = vmatprep.subr.bf16.mxu0 %v3371_v62  ;;  %2703 = vmatprep.subr.bf16.mxu1 %v3373_v0  ;;  %v3049_v62 = vcombine.high %v131_v56, %v135_v57  ;;  %v138_v0 = vld [vmem:[#allocation2 + $0x90] sm:$0xff]  ;;  %v191_v55 = vld [vmem:[#allocation2 + $0x238] sm:$0xff] }
  0xd1   :  { %v3054_v13 = vcombine.low %v138_v0, %v142_v1 }
  0xd3   :  { %2581 = vmatpush1.bf16.msra.mxu0 %v3370_v5  ;;  %2704 = vmatpush1.bf16.msra.mxu1 %v3372_v6  ;;  %v3048_v5 = vcombine.low %v131_v56, %v135_v57  ;;  %v3055_v6 = vcombine.high %v138_v0, %v142_v1  ;;  %v3096_v57 = vcombine.low %v179_v45, %v183_v46  ;;  %v195_v0 = vld [vmem:[#allocation2 + $0x258] sm:$0xff] }
  0xd4   :  { %2582 = vmatprep.subr.bf16.mxu0 %v3379_v7  ;;  %2705 = vmatprep.subr.bf16.mxu1 %v3381_v8  ;;  %v3057_v7 = vcombine.high %v139_v2, %v143_v3  ;;  %v146_v8 = vld [vmem:[#allocation2 + $0xd0] sm:$0xff]  ;;  %v199_v1 = vld [vmem:[#allocation2 + $0x278] sm:$0xff] }
  0xd5   :  { %v3062_v21 = vcombine.low %v146_v8, %v150_v10 }
  0xd7   :  { %2583 = vmatpush1.bf16.msra.mxu0 %v3378_v14  ;;  %2706 = vmatpush1.bf16.msra.mxu1 %v3380_v15  ;;  %v3056_v14 = vcombine.low %v139_v2, %v143_v3  ;;  %v3063_v15 = vcombine.high %v146_v8, %v150_v10  ;;  %v3104_v3 = vcombine.low %v187_v54, %v191_v55  ;;  %v203_v8 = vld [vmem:[#allocation2 + $0x298] sm:$0xff] }
  0xd8   :  { %2584 = vmatprep.subr.bf16.mxu0 %v3387_v16  ;;  %2707 = vmatprep.subr.bf16.mxu1 %v3389_v17  ;;  %v3065_v16 = vcombine.high %v147_v11, %v151_v12  ;;  %v154_v17 = vld [vmem:[#allocation2 + $0x110] sm:$0xff]  ;;  %v207_v10 = vld [vmem:[#allocation2 + $0x2b8] sm:$0xff] }
  0xd9   :  { %v3070_v29 = vcombine.low %v154_v17, %v158_v18 }
  0xdb   :  { %2585 = vmatpush1.bf16.msra.mxu0 %v3386_v22  ;;  %2708 = vmatpush1.bf16.msra.mxu1 %v3388_v23  ;;  %v3064_v22 = vcombine.low %v147_v11, %v151_v12  ;;  %v3071_v23 = vcombine.high %v154_v17, %v158_v18  ;;  %v3112_v12 = vcombine.low %v195_v0, %v199_v1  ;;  %v211_v17 = vld [vmem:[#allocation2 + $0x2d8] sm:$0xff] }
  0xdc   :  { %2586 = vmatprep.subr.bf16.mxu0 %v3395_v24  ;;  %2709 = vmatprep.subr.bf16.mxu1 %v3397_v26  ;;  %v162_v24 = vld [vmem:[#allocation2 + $0x150] sm:$0xff]  ;;  %v215_v18 = vld [vmem:[#allocation2 + $0x2f8] sm:$0xff] }
  0xdd   :  { %v166_v26 = vld [vmem:[#allocation2 + $0x170] sm:$0xff] }
  0xde   :  { %v3078_v38 = vcombine.low %v162_v24, %v166_v26 }
  0xdf   :  { %2587 = vmatpush1.bf16.msra.mxu0 %v3394_v30  ;;  %2710 = vmatpush1.bf16.msra.mxu1 %v3396_v32  ;;  %v3079_v30 = vcombine.high %v162_v24, %v166_v26  ;;  %v3081_v32 = vcombine.high %v163_v27, %v167_v28  ;;  %v219_v24 = vld [vmem:[#allocation2 + $0x318] sm:$0xff]  ;;  %v3128_v28 = vcombine.low %v211_v17, %v215_v18 }
  0xe0   :  { %2588 = vmatprep.subr.bf16.mxu0 %v3403_v33  ;;  %2711 = vmatprep.subr.bf16.mxu1 %v3405_v34  ;;  %v170_v33 = vld [vmem:[#allocation2 + $0x190] sm:$0xff]  ;;  %v223_v26 = vld [vmem:[#allocation2 + $0x338] sm:$0xff] }
  0xe1   :  { %v174_v34 = vld [vmem:[#allocation2 + $0x1b0] sm:$0xff] }
  0xe2   :  { %v3086_v47 = vcombine.low %v170_v33, %v174_v34 }
  0xe3   :  { %2589 = vmatpush1.bf16.msra.mxu0 %v3402_v41  ;;  %2712 = vmatpush1.bf16.msra.mxu1 %v3404_v42  ;;  %v3087_v41 = vcombine.high %v170_v33, %v174_v34  ;;  %v3089_v42 = vcombine.high %v171_v36, %v175_v37  ;;  %v227_v33 = vld [vmem:[#allocation2 + $0x358] sm:$0xff]  ;;  %v3136_v37 = vcombine.low %v219_v24, %v223_v26 }
  0xe4   :  { %2590 = vmatprep.subr.bf16.mxu0 %v3411_v44  ;;  %2713 = vmatprep.subr.bf16.mxu1 %v3413_v53  ;;  %v178_v44 = vld [vmem:[#allocation2 + $0x1d0] sm:$0xff]  ;;  %v231_v34 = vld [vmem:[#allocation2 + $0x378] sm:$0xff] }
  0xe5   :  { %v182_v53 = vld [vmem:[#allocation2 + $0x1f0] sm:$0xff] }
  0xe6   :  { %v3094_v56 = vcombine.low %v178_v44, %v182_v53 }
  0xe7   :  { %2591 = vmatpush1.bf16.msra.mxu0 %v3410_v49  ;;  %2714 = vmatpush1.bf16.msra.mxu1 %v3412_v50  ;;  %v3095_v49 = vcombine.high %v178_v44, %v182_v53  ;;  %v3097_v50 = vcombine.high %v179_v45, %v183_v46  ;;  %v235_v44 = vld [vmem:[#allocation2 + $0x398] sm:$0xff]  ;;  %v3144_v46 = vcombine.low %v227_v33, %v231_v34 }
  0xe8   :  { %2724 = vmatprep.subr.bf16.mxu0 %v3039_v51  ;;  %2847 = vmatprep.subr.bf16.mxu1 %v3041_v52  ;;  %v186_v51 = vld [vmem:[#allocation2 + $0x210] sm:$0xff]  ;;  %v239_v53 = vld [vmem:[#allocation2 + $0x3b8] sm:$0xff] }
  0xe9   :  { %v190_v52 = vld [vmem:[#allocation2 + $0x230] sm:$0xff] }
  0xea   :  { %2593 = vmatmul.mubr.bf16.vlgmr.msra.gmra.mrb[0].mxu0 %v3610_v31  ;;  %2716 = vmatmul.mubr.bf16.vlgmr.msra.gmra.mrb[0].mxu1 %v3610_v31  ;;  %v3102_v2 = vcombine.low %v186_v51, %v190_v52 }
  0xeb   :  { %2725 = vmatpush1.bf16.msra.mxu0 %v3038_v58  ;;  %2848 = vmatpush1.bf16.msra.mxu1 %v3040_v60  ;;  %v3103_v58 = vcombine.high %v186_v51, %v190_v52  ;;  %v3105_v60 = vcombine.high %v187_v54, %v191_v55  ;;  %v243_v51 = vld [vmem:[#allocation2 + $0x3d8] sm:$0xff]  ;;  %v3152_v55 = vcombine.low %v235_v44, %v239_v53 }
  0xec   :  { %2726 = vmatprep.subr.bf16.mxu0 %v3047_v61  ;;  %2849 = vmatprep.subr.bf16.mxu1 %v3049_v62  ;;  %v194_v61 = vld [vmem:[#allocation2 + $0x250] sm:$0xff]  ;;  %v247_v52 = vld [vmem:[#allocation2 + $0x3f8] sm:$0xff] }
  0xed   :  { %2756 = vmatprep.mubr.bf16.mxu0 %v3598_v9  ;;  %2879 = vmatprep.mubr.bf16.mxu1 %v3598_v9  ;;  %v3073_v9 = vcombine.high %v155_v19, %v159_v20  ;;  %v198_v62 = vld [vmem:[#allocation2 + $0x270] sm:$0xff]  ;;  %v3120_v20 = vcombine.low %v203_v8, %v207_v10 }
  0xee   :  { %v3110_v11 = vcombine.low %v194_v61, %v198_v62 }
  0xef   :  { %2727 = vmatpush1.bf16.msra.mxu0 %v3046_v4  ;;  %2850 = vmatpush1.bf16.msra.mxu1 %v3048_v5  ;;  %v3111_v4 = vcombine.high %v194_v61, %v198_v62  ;;  %v3113_v5 = vcombine.high %v195_v0, %v199_v1  ;;  %v251_v61 = vld [vmem:[#allocation2 + $0x418] sm:$0xff]  ;;  %v3160_v1 = vcombine.low %v243_v51, %v247_v52 }
  0xf0   :  { %2728 = vmatprep.subr.bf16.mxu0 %v3055_v6  ;;  %2851 = vmatprep.subr.bf16.mxu1 %v3057_v7  ;;  %v202_v6 = vld [vmem:[#allocation2 + $0x290] sm:$0xff]  ;;  %v255_v62 = vld [vmem:[#allocation2 + $0x438] sm:$0xff] }
  0xf1   :  { %v206_v7 = vld [vmem:[#allocation2 + $0x2b0] sm:$0xff] }
  0xf2   :  { %v3118_v19 = vcombine.low %v202_v6, %v206_v7 }
  0xf3   :  { %2729 = vmatpush1.bf16.msra.mxu0 %v3054_v13  ;;  %2852 = vmatpush1.bf16.msra.mxu1 %v3056_v14  ;;  %v3119_v13 = vcombine.high %v202_v6, %v206_v7  ;;  %v3121_v14 = vcombine.high %v203_v8, %v207_v10  ;;  %v259_v6 = vld [vmem:[#allocation2 + $0x458] sm:$0xff]  ;;  %v3168_v10 = vcombine.low %v251_v61, %v255_v62 }
  0xf4   :  { %2730 = vmatprep.subr.bf16.mxu0 %v3063_v15  ;;  %2853 = vmatprep.subr.bf16.mxu1 %v3065_v16  ;;  %v210_v15 = vld [vmem:[#allocation2 + $0x2d0] sm:$0xff]  ;;  %v263_v7 = vld [vmem:[#allocation2 + $0x478] sm:$0xff] }
  0xf5   :  { %v214_v16 = vld [vmem:[#allocation2 + $0x2f0] sm:$0xff] }
  0xf6   :  { %v3126_v27 = vcombine.low %v210_v15, %v214_v16 }
  0xf7   :  { %2731 = vmatpush1.bf16.msra.mxu0 %v3062_v21  ;;  %2854 = vmatpush1.bf16.msra.mxu1 %v3064_v22  ;;  %v3127_v21 = vcombine.high %v210_v15, %v214_v16  ;;  %v3129_v22 = vcombine.high %v211_v17, %v215_v18  ;;  %v267_v15 = vld [vmem:[#allocation2 + $0x498] sm:$0xff]  ;;  %v3176_v18 = vcombine.low %v259_v6, %v263_v7 }
  0xf8   :  { %2732 = vmatprep.subr.bf16.mxu0 %v3071_v23  ;;  %2855 = vmatprep.subr.bf16.mxu1 %v3073_v9  ;;  %v218_v23 = vld [vmem:[#allocation2 + $0x310] sm:$0xff]  ;;  %v271_v16 = vld [vmem:[#allocation2 + $0x4b8] sm:$0xff] }
  0xf9   :  { %v222_v9 = vld [vmem:[#allocation2 + $0x330] sm:$0xff] }
  0xfa   :  { %v3134_v36 = vcombine.low %v218_v23, %v222_v9 }
  0xfb   :  { %2733 = vmatpush1.bf16.msra.mxu0 %v3070_v29  ;;  %2856 = vmatpush1.bf16.msra.mxu1 %v3072_v59  ;;  %v3135_v29 = vcombine.high %v218_v23, %v222_v9  ;;  %v3137_v59 = vcombine.high %v219_v24, %v223_v26  ;;  %v275_v23 = vld [vmem:[#allocation2 + $0x4d8] sm:$0xff] }
  0xfc   :  { %2734 = vmatprep.subr.bf16.mxu0 %v3079_v30  ;;  %2857 = vmatprep.subr.bf16.mxu1 %v3081_v32  ;;  %v226_v30 = vld [vmem:[#allocation2 + $0x350] sm:$0xff]  ;;  %v279_v9 = vld [vmem:[#allocation2 + $0x4f8] sm:$0xff] }
  0xfd   :  { %v230_v32 = vld [vmem:[#allocation2 + $0x370] sm:$0xff] }
  0xfe   :  { %v3142_v45 = vcombine.low %v226_v30, %v230_v32 }
  0xff   :  { %2735 = vmatpush1.bf16.msra.mxu0 %v3078_v38  ;;  %2858 = vmatpush1.bf16.msra.mxu1 %v3080_v39  ;;  %v3143_v38 = vcombine.high %v226_v30, %v230_v32  ;;  %v3145_v39 = vcombine.high %v227_v33, %v231_v34  ;;  %v287_v30 = vld [vmem:[#allocation2 + $0x538] sm:$0xff]  ;;  %v3192_v33 = vcombine.low %v275_v23, %v279_v9 }
 0x100   :  { %2736 = vmatprep.subr.bf16.mxu0 %v3087_v41  ;;  %2859 = vmatprep.subr.bf16.mxu1 %v3089_v42  ;;  %v234_v41 = vld [vmem:[#allocation2 + $0x390] sm:$0xff] }
 0x101   :  { %v238_v42 = vld [vmem:[#allocation2 + $0x3b0] sm:$0xff] }
 0x102   :  { %v3150_v54 = vcombine.low %v234_v41, %v238_v42 }
 0x103   :  { %2737 = vmatpush1.bf16.msra.mxu0 %v3086_v47  ;;  %2860 = vmatpush1.bf16.msra.mxu1 %v3088_v48  ;;  %v3151_v47 = vcombine.high %v234_v41, %v238_v42  ;;  %v3153_v48 = vcombine.high %v235_v44, %v239_v53 }
 0x104   :  { %2738 = vmatprep.subr.bf16.mxu0 %v3095_v49  ;;  %2861 = vmatprep.subr.bf16.mxu1 %v3097_v50  ;;  %v242_v49 = vld [vmem:[#allocation2 + $0x3d0] sm:$0xff] }
 0x105   :  { %v246_v50 = vld [vmem:[#allocation2 + $0x3f0] sm:$0xff] }
 0x106   :  { %v3158_v0 = vcombine.low %v242_v49, %v246_v50 }
 0x107   :  { %2739 = vmatpush1.bf16.msra.mxu0 %v3094_v56  ;;  %2862 = vmatpush1.bf16.msra.mxu1 %v3096_v57  ;;  %v3159_v56 = vcombine.high %v242_v49, %v246_v50  ;;  %v3161_v57 = vcombine.high %v243_v51, %v247_v52 }
 0x108   :  { %2740 = vmatprep.subr.bf16.mxu0 %v3103_v58  ;;  %2863 = vmatprep.subr.bf16.mxu1 %v3105_v60  ;;  %v250_v58 = vld [vmem:[#allocation2 + $0x410] sm:$0xff] }
 0x109   :  { %v254_v60 = vld [vmem:[#allocation2 + $0x430] sm:$0xff] }
 0x10a   :  { %v3166_v8 = vcombine.low %v250_v58, %v254_v60 }
 0x10b   :  { %2741 = vmatpush1.bf16.msra.mxu0 %v3102_v2  ;;  %2864 = vmatpush1.bf16.msra.mxu1 %v3104_v3  ;;  %v3167_v2 = vcombine.high %v250_v58, %v254_v60  ;;  %v3169_v3 = vcombine.high %v251_v61, %v255_v62 }
 0x10c   :  { %2742 = vmatprep.subr.bf16.mxu0 %v3111_v4  ;;  %2865 = vmatprep.subr.bf16.mxu1 %v3113_v5  ;;  %v258_v4 = vld [vmem:[#allocation2 + $0x450] sm:$0xff] }
 0x10d   :  { %v262_v5 = vld [vmem:[#allocation2 + $0x470] sm:$0xff] }
 0x10e   :  { %v3174_v17 = vcombine.low %v258_v4, %v262_v5 }
 0x10f   :  { %2743 = vmatpush1.bf16.msra.mxu0 %v3110_v11  ;;  %2866 = vmatpush1.bf16.msra.mxu1 %v3112_v12  ;;  %v3175_v11 = vcombine.high %v258_v4, %v262_v5  ;;  %v3177_v12 = vcombine.high %v259_v6, %v263_v7 }
 0x110   :  { %2744 = vmatprep.subr.bf16.mxu0 %v3119_v13  ;;  %2867 = vmatprep.subr.bf16.mxu1 %v3121_v14  ;;  %v266_v13 = vld [vmem:[#allocation2 + $0x490] sm:$0xff] }
 0x111   :  { %v270_v14 = vld [vmem:[#allocation2 + $0x4b0] sm:$0xff] }
 0x112   :  { %v3182_v24 = vcombine.low %v266_v13, %v270_v14 }
 0x113   :  { %2745 = vmatpush1.bf16.msra.mxu0 %v3118_v19  ;;  %2868 = vmatpush1.bf16.msra.mxu1 %v3120_v20  ;;  %v3183_v19 = vcombine.high %v266_v13, %v270_v14  ;;  %v3185_v20 = vcombine.high %v267_v15, %v271_v16 }
 0x114   :  { %2746 = vmatprep.subr.bf16.mxu0 %v3127_v21  ;;  %2869 = vmatprep.subr.bf16.mxu1 %v3129_v22  ;;  %v274_v21 = vld [vmem:[#allocation2 + $0x4d0] sm:$0xff] }
 0x115   :  { %v278_v22 = vld [vmem:[#allocation2 + $0x4f0] sm:$0xff] }
 0x116   :  { %v3191_v26 = vcombine.high %v274_v21, %v278_v22  ;;  %v3190_v32 = vcombine.low %v274_v21, %v278_v22 }
 0x117   :  { %2747 = vmatpush1.bf16.msra.mxu0 %v3126_v27  ;;  %2870 = vmatpush1.bf16.msra.mxu1 %v3128_v28  ;;  %v3193_v27 = vcombine.high %v275_v23, %v279_v9  ;;  %v282_v28 = vld [vmem:[#allocation2 + $0x510] sm:$0xff] }
 0x118   :  { %2748 = vmatprep.subr.bf16.mxu0 %v3135_v29  ;;  %2871 = vmatprep.subr.bf16.mxu1 %v3137_v59  ;;  %v286_v29 = vld [vmem:[#allocation2 + $0x530] sm:$0xff]  ;;  %v283_v59 = vld [vmem:[#allocation2 + $0x518] sm:$0xff] }
 0x119   :  { %v3199_v34 = vcombine.high %v282_v28, %v286_v29  ;;  %v3198_v41 = vcombine.low %v282_v28, %v286_v29  ;;  %v3200_v42 = vcombine.low %v283_v59, %v287_v30 }
 0x11b   :  { %2749 = vmatpush1.bf16.msra.mxu0 %v3134_v36  ;;  %2872 = vmatpush1.bf16.msra.mxu1 %v3136_v37  ;;  %v290_v36 = vld [vmem:[#allocation2 + $0x550] sm:$0xff] }
 0x11c   :  { %2750 = vmatprep.subr.bf16.mxu0 %v3143_v38  ;;  %2873 = vmatprep.subr.bf16.mxu1 %v3145_v39  ;;  %v294_v37 = vld [vmem:[#allocation2 + $0x570] sm:$0xff]  ;;  %v291_v38 = vld [vmem:[#allocation2 + $0x558] sm:$0xff] }
 0x11d   :  { %v295_v39 = vld [vmem:[#allocation2 + $0x578] sm:$0xff]  ;;  %v3207_v44 = vcombine.high %v290_v36, %v294_v37  ;;  %v3206_v49 = vcombine.low %v290_v36, %v294_v37 }
 0x11e   :  { %v3209_v53 = vcombine.high %v291_v38, %v295_v39  ;;  %v3208_v50 = vcombine.low %v291_v38, %v295_v39 }
 0x11f   :  { %2751 = vmatpush1.bf16.msra.mxu0 %v3142_v45  ;;  %2874 = vmatpush1.bf16.msra.mxu1 %v3144_v46  ;;  %v298_v45 = vld [vmem:[#allocation2 + $0x590] sm:$0xff] }
 0x120   :  { %2752 = vmatprep.subr.bf16.mxu0 %v3151_v47  ;;  %2875 = vmatprep.subr.bf16.mxu1 %v3153_v48  ;;  %v302_v46 = vld [vmem:[#allocation2 + $0x5b0] sm:$0xff]  ;;  %v299_v47 = vld [vmem:[#allocation2 + $0x598] sm:$0xff] }
 0x121   :  { %v303_v48 = vld [vmem:[#allocation2 + $0x5b8] sm:$0xff]  ;;  %v3215_v51 = vcombine.high %v298_v45, %v302_v46  ;;  %v3214_v58 = vcombine.low %v298_v45, %v302_v46 }
 0x122   :  { %v3217_v52 = vcombine.high %v299_v47, %v303_v48  ;;  %v3216_v60 = vcombine.low %v299_v47, %v303_v48 }
 0x123   :  { %2753 = vmatpush1.bf16.msra.mxu0 %v3150_v54  ;;  %2876 = vmatpush1.bf16.msra.mxu1 %v3152_v55  ;;  %v306_v54 = vld [vmem:[#allocation2 + $0x5d0] sm:$0xff] }
 0x124   :  { %2754 = vmatprep.subr.bf16.mxu0 %v3159_v56  ;;  %2877 = vmatprep.subr.bf16.mxu1 %v3161_v57  ;;  %v310_v55 = vld [vmem:[#allocation2 + $0x5f0] sm:$0xff]  ;;  %v307_v56 = vld [vmem:[#allocation2 + $0x5d8] sm:$0xff] }
 0x125   :  { %v311_v57 = vld [vmem:[#allocation2 + $0x5f8] sm:$0xff]  ;;  %v3223_v61 = vcombine.high %v306_v54, %v310_v55  ;;  %v3222_v4 = vcombine.low %v306_v54, %v310_v55 }
 0x126   :  { %v3225_v62 = vcombine.high %v307_v56, %v311_v57  ;;  %v3224_v5 = vcombine.low %v307_v56, %v311_v57 }
 0x127   :  { %2755 = vmatpush1.bf16.msra.mxu0 %v3158_v0  ;;  %2878 = vmatpush1.bf16.msra.mxu1 %v3160_v1  ;;  %v314_v0 = vld [vmem:[#allocation2 + $0x610] sm:$0xff] }
 0x128   :  { %2765 = vmatprep.subr.bf16.mxu0 %v3167_v2  ;;  %2888 = vmatprep.subr.bf16.mxu1 %v3169_v3  ;;  %v318_v1 = vld [vmem:[#allocation2 + $0x630] sm:$0xff]  ;;  %v315_v2 = vld [vmem:[#allocation2 + $0x618] sm:$0xff] }
 0x129   :  { %v319_v3 = vld [vmem:[#allocation2 + $0x638] sm:$0xff]  ;;  %v3231_v6 = vcombine.high %v314_v0, %v318_v1  ;;  %v3230_v13 = vcombine.low %v314_v0, %v318_v1 }
 0x12a   :  { %2757 = vmatmul.mubr.bf16.vlgmr.msra.gmra.mrb[4].mxu0 %v3607_v25  ;;  %2880 = vmatmul.mubr.bf16.vlgmr.msra.gmra.mrb[4].mxu1 %v3607_v25  ;;  %v3184_v25 = vcombine.low %v267_v15, %v271_v16  ;;  %v3233_v7 = vcombine.high %v315_v2, %v319_v3  ;;  %v3232_v14 = vcombine.low %v315_v2, %v319_v3 }
 0x12b   :  { %2766 = vmatpush1.bf16.msra.mxu0 %v3166_v8  ;;  %2889 = vmatpush1.bf16.msra.mxu1 %v3168_v10  ;;  %v322_v8 = vld [vmem:[#allocation2 + $0x650] sm:$0xff] }
 0x12c   :  { %2767 = vmatprep.subr.bf16.mxu0 %v3175_v11  ;;  %2890 = vmatprep.subr.bf16.mxu1 %v3177_v12  ;;  %v326_v10 = vld [vmem:[#allocation2 + $0x670] sm:$0xff]  ;;  %v323_v11 = vld [vmem:[#allocation2 + $0x658] sm:$0xff] }
 0x12d   :  { %2797 = vmatprep.mubr.bf16.mxu0 %v3614_v63  ;;  %2920 = vmatprep.mubr.bf16.mxu1 %v3614_v63  ;;  %v3201_v63 = vcombine.high %v283_v59, %v287_v30  ;;  %v327_v12 = vld [vmem:[#allocation2 + $0x678] sm:$0xff]  ;;  %v3239_v15 = vcombine.high %v322_v8, %v326_v10  ;;  %v3238_v21 = vcombine.low %v322_v8, %v326_v10 }
 0x12e   :  { %v3241_v16 = vcombine.high %v323_v11, %v327_v12  ;;  %v3240_v22 = vcombine.low %v323_v11, %v327_v12 }
 0x12f   :  { %2768 = vmatpush1.bf16.msra.mxu0 %v3174_v17  ;;  %2891 = vmatpush1.bf16.msra.mxu1 %v3176_v18  ;;  %v330_v17 = vld [vmem:[#allocation2 + $0x690] sm:$0xff] }
 0x130   :  { %2769 = vmatprep.subr.bf16.mxu0 %v3183_v19  ;;  %2892 = vmatprep.subr.bf16.mxu1 %v3185_v20  ;;  %v334_v18 = vld [vmem:[#allocation2 + $0x6b0] sm:$0xff]  ;;  %v331_v19 = vld [vmem:[#allocation2 + $0x698] sm:$0xff] }
 0x131   :  { %v335_v20 = vld [vmem:[#allocation2 + $0x6b8] sm:$0xff]  ;;  %v3247_v23 = vcombine.high %v330_v17, %v334_v18  ;;  %v3246_v28 = vcombine.low %v330_v17, %v334_v18 }
 0x132   :  { %v3249_v9 = vcombine.high %v331_v19, %v335_v20  ;;  %v3248_v29 = vcombine.low %v331_v19, %v335_v20 }
 0x133   :  { %2770 = vmatpush1.bf16.msra.mxu0 %v3182_v24  ;;  %2893 = vmatpush1.bf16.msra.mxu1 %v3184_v25  ;;  %v338_v24 = vld [vmem:[#allocation2 + $0x6d0] sm:$0xff] }
 0x134   :  { %2771 = vmatprep.subr.bf16.mxu0 %v3191_v26  ;;  %2894 = vmatprep.subr.bf16.mxu1 %v3193_v27  ;;  %v342_v25 = vld [vmem:[#allocation2 + $0x6f0] sm:$0xff]  ;;  %v339_v26 = vld [vmem:[#allocation2 + $0x6d8] sm:$0xff] }
 0x135   :  { %v343_v27 = vld [vmem:[#allocation2 + $0x6f8] sm:$0xff]  ;;  %v3255_v59 = vcombine.high %v338_v24, %v342_v25  ;;  %v3254_v36 = vcombine.low %v338_v24, %v342_v25 }
 0x136   :  { %v3257_v30 = vcombine.high %v339_v26, %v343_v27  ;;  %v3256_v37 = vcombine.low %v339_v26, %v343_v27 }
 0x137   :  { %2772 = vmatpush1.bf16.msra.mxu0 %v3190_v32  ;;  %2895 = vmatpush1.bf16.msra.mxu1 %v3192_v33  ;;  %v346_v32 = vld [vmem:[#allocation2 + $0x710] sm:$0xff] }
 0x138   :  { %2773 = vmatprep.subr.bf16.mxu0 %v3199_v34  ;;  %2896 = vmatprep.subr.bf16.mxu1 %v3201_v63  ;;  %v350_v33 = vld [vmem:[#allocation2 + $0x730] sm:$0xff]  ;;  %v347_v34 = vld [vmem:[#allocation2 + $0x718] sm:$0xff] }
 0x139   :  { %v351_v63 = vld [vmem:[#allocation2 + $0x738] sm:$0xff]  ;;  %v3263_v38 = vcombine.high %v346_v32, %v350_v33  ;;  %v3262_v45 = vcombine.low %v346_v32, %v350_v33 }
 0x13a   :  { %v3265_v39 = vcombine.high %v347_v34, %v351_v63  ;;  %v3264_v46 = vcombine.low %v347_v34, %v351_v63  ;;  %v410_v63 = vld [vmem:[#allocation2 + $0x910] sm:$0xff] }
 0x13b   :  { %2774 = vmatpush1.bf16.msra.mxu0 %v3198_v41  ;;  %2897 = vmatpush1.bf16.msra.mxu1 %v3200_v42  ;;  %v354_v41 = vld [vmem:[#allocation2 + $0x750] sm:$0xff] }
 0x13c   :  { %2775 = vmatprep.subr.bf16.mxu0 %v3207_v44  ;;  %2898 = vmatprep.subr.bf16.mxu1 %v3209_v53  ;;  %v358_v42 = vld [vmem:[#allocation2 + $0x770] sm:$0xff]  ;;  %v355_v44 = vld [vmem:[#allocation2 + $0x758] sm:$0xff] }
 0x13d   :  { %v359_v53 = vld [vmem:[#allocation2 + $0x778] sm:$0xff]  ;;  %v3271_v47 = vcombine.high %v354_v41, %v358_v42  ;;  %v3270_v54 = vcombine.low %v354_v41, %v358_v42 }
 0x13e   :  { %v3273_v48 = vcombine.high %v355_v44, %v359_v53  ;;  %v3272_v55 = vcombine.low %v355_v44, %v359_v53  ;;  %v418_v44 = vld [vmem:[#allocation2 + $0x950] sm:$0xff] }
 0x13f   :  { %2776 = vmatpush1.bf16.msra.mxu0 %v3206_v49  ;;  %2899 = vmatpush1.bf16.msra.mxu1 %v3208_v50  ;;  %v362_v49 = vld [vmem:[#allocation2 + $0x790] sm:$0xff] }
 0x140   :  { %2777 = vmatprep.subr.bf16.mxu0 %v3215_v51  ;;  %2900 = vmatprep.subr.bf16.mxu1 %v3217_v52  ;;  %v366_v50 = vld [vmem:[#allocation2 + $0x7b0] sm:$0xff]  ;;  %v363_v51 = vld [vmem:[#allocation2 + $0x798] sm:$0xff] }
 0x141   :  { %v367_v52 = vld [vmem:[#allocation2 + $0x7b8] sm:$0xff]  ;;  %v3279_v56 = vcombine.high %v362_v49, %v366_v50  ;;  %v3278_v0 = vcombine.low %v362_v49, %v366_v50  ;;  %v422_v53 = vld [vmem:[#allocation2 + $0x970] sm:$0xff] }
 0x142   :  { %v3281_v57 = vcombine.high %v363_v51, %v367_v52  ;;  %v3280_v1 = vcombine.low %v363_v51, %v367_v52  ;;  %v3335_v49 = vcombine.high %v418_v44, %v422_v53  ;;  %v426_v51 = vld [vmem:[#allocation2 + $0x990] sm:$0xff] }
 0x143   :  { %2778 = vmatpush1.bf16.msra.mxu0 %v3214_v58  ;;  %2901 = vmatpush1.bf16.msra.mxu1 %v3216_v60  ;;  %v370_v58 = vld [vmem:[#allocation2 + $0x7d0] sm:$0xff] }
 0x144   :  { %2779 = vmatprep.subr.bf16.mxu0 %v3223_v61  ;;  %2902 = vmatprep.subr.bf16.mxu1 %v3225_v62  ;;  %v374_v60 = vld [vmem:[#allocation2 + $0x7f0] sm:$0xff]  ;;  %v371_v61 = vld [vmem:[#allocation2 + $0x7d8] sm:$0xff] }
 0x145   :  { %v375_v62 = vld [vmem:[#allocation2 + $0x7f8] sm:$0xff]  ;;  %v3287_v2 = vcombine.high %v370_v58, %v374_v60  ;;  %v3286_v8 = vcombine.low %v370_v58, %v374_v60  ;;  %v430_v52 = vld [vmem:[#allocation2 + $0x9b0] sm:$0xff] }
 0x146   :  { %v3289_v3 = vcombine.high %v371_v61, %v375_v62  ;;  %v3288_v10 = vcombine.low %v371_v61, %v375_v62  ;;  %v3343_v58 = vcombine.high %v426_v51, %v430_v52  ;;  %v434_v61 = vld [vmem:[#allocation2 + $0x9d0] sm:$0xff] }
 0x147   :  { %2780 = vmatpush1.bf16.msra.mxu0 %v3222_v4  ;;  %2903 = vmatpush1.bf16.msra.mxu1 %v3224_v5  ;;  %v378_v4 = vld [vmem:[#allocation2 + $0x810] sm:$0xff] }
 0x148   :  { %2781 = vmatprep.subr.bf16.mxu0 %v3231_v6  ;;  %2904 = vmatprep.subr.bf16.mxu1 %v3233_v7  ;;  %v382_v5 = vld [vmem:[#allocation2 + $0x830] sm:$0xff]  ;;  %v379_v6 = vld [vmem:[#allocation2 + $0x818] sm:$0xff] }
 0x149   :  { %v383_v7 = vld [vmem:[#allocation2 + $0x838] sm:$0xff]  ;;  %v3295_v11 = vcombine.high %v378_v4, %v382_v5  ;;  %v3294_v17 = vcombine.low %v378_v4, %v382_v5  ;;  %v438_v62 = vld [vmem:[#allocation2 + $0x9f0] sm:$0xff] }
 0x14a   :  { %v3297_v12 = vcombine.high %v379_v6, %v383_v7  ;;  %v3296_v18 = vcombine.low %v379_v6, %v383_v7  ;;  %v3351_v4 = vcombine.high %v434_v61, %v438_v62  ;;  %v442_v6 = vld [vmem:[#allocation2 + $0xa10] sm:$0xff] }
 0x14b   :  { %2782 = vmatpush1.bf16.msra.mxu0 %v3230_v13  ;;  %2905 = vmatpush1.bf16.msra.mxu1 %v3232_v14  ;;  %v386_v13 = vld [vmem:[#allocation2 + $0x850] sm:$0xff] }
 0x14c   :  { %2783 = vmatprep.subr.bf16.mxu0 %v3239_v15  ;;  %2906 = vmatprep.subr.bf16.mxu1 %v3241_v16  ;;  %v390_v14 = vld [vmem:[#allocation2 + $0x870] sm:$0xff]  ;;  %v387_v15 = vld [vmem:[#allocation2 + $0x858] sm:$0xff] }
 0x14d   :  { %v391_v16 = vld [vmem:[#allocation2 + $0x878] sm:$0xff]  ;;  %v3303_v19 = vcombine.high %v386_v13, %v390_v14  ;;  %v3302_v24 = vcombine.low %v386_v13, %v390_v14  ;;  %v446_v7 = vld [vmem:[#allocation2 + $0xa30] sm:$0xff] }
 0x14e   :  { %v3305_v20 = vcombine.high %v387_v15, %v391_v16  ;;  %v3304_v25 = vcombine.low %v387_v15, %v391_v16  ;;  %v3359_v13 = vcombine.high %v442_v6, %v446_v7  ;;  %v450_v15 = vld [vmem:[#allocation2 + $0xa50] sm:$0xff] }
 0x14f   :  { %2784 = vmatpush1.bf16.msra.mxu0 %v3238_v21  ;;  %2907 = vmatpush1.bf16.msra.mxu1 %v3240_v22  ;;  %v394_v21 = vld [vmem:[#allocation2 + $0x890] sm:$0xff] }
 0x150   :  { %2785 = vmatprep.subr.bf16.mxu0 %v3247_v23  ;;  %2908 = vmatprep.subr.bf16.mxu1 %v3249_v9  ;;  %v398_v22 = vld [vmem:[#allocation2 + $0x8b0] sm:$0xff]  ;;  %v395_v23 = vld [vmem:[#allocation2 + $0x898] sm:$0xff] }
 0x151   :  { %v399_v9 = vld [vmem:[#allocation2 + $0x8b8] sm:$0xff]  ;;  %v3311_v26 = vcombine.high %v394_v21, %v398_v22  ;;  %v3310_v32 = vcombine.low %v394_v21, %v398_v22  ;;  %v454_v16 = vld [vmem:[#allocation2 + $0xa70] sm:$0xff] }
 0x152   :  { %v3313_v27 = vcombine.high %v395_v23, %v399_v9  ;;  %v3367_v21 = vcombine.high %v450_v15, %v454_v16 }
 0x153   :  { %2786 = vmatpush1.bf16.msra.mxu0 %v3246_v28  ;;  %2909 = vmatpush1.bf16.msra.mxu1 %v3248_v29  ;;  %v402_v28 = vld [vmem:[#allocation2 + $0x8d0] sm:$0xff] }
 0x154   :  { %2787 = vmatprep.subr.bf16.mxu0 %v3255_v59  ;;  %2910 = vmatprep.subr.bf16.mxu1 %v3257_v30  ;;  %v406_v29 = vld [vmem:[#allocation2 + $0x8f0] sm:$0xff]  ;;  %v403_v59 = vld [vmem:[#allocation2 + $0x8d8] sm:$0xff] }
 0x155   :  { %v407_v30 = vld [vmem:[#allocation2 + $0x8f8] sm:$0xff]  ;;  %v3319_v33 = vcombine.high %v402_v28, %v406_v29 }
 0x156   :  { %v3321_v34 = vcombine.high %v403_v59, %v407_v30  ;;  %v3320_v41 = vcombine.low %v403_v59, %v407_v30  ;;  %v466_v59 = vld [vmem:[#allocation2 + $0xad0] sm:$0xff] }
 0x157   :  { %2788 = vmatpush1.bf16.msra.mxu0 %v3254_v36  ;;  %2911 = vmatpush1.bf16.msra.mxu1 %v3256_v37  ;;  %v414_v36 = vld [vmem:[#allocation2 + $0x930] sm:$0xff]  ;;  %v411_v37 = vld [vmem:[#allocation2 + $0x918] sm:$0xff] }
 0x158   :  { %2789 = vmatprep.subr.bf16.mxu0 %v3263_v38  ;;  %2912 = vmatprep.subr.bf16.mxu1 %v3265_v39  ;;  %v415_v38 = vld [vmem:[#allocation2 + $0x938] sm:$0xff]  ;;  %v3318_v39 = vcombine.low %v402_v28, %v406_v29  ;;  %v3327_v42 = vcombine.high %v410_v63, %v414_v36  ;;  %v470_v30 = vld [vmem:[#allocation2 + $0xaf0] sm:$0xff] }
 0x15b   :  { %2790 = vmatpush1.bf16.msra.mxu0 %v3262_v45  ;;  %2913 = vmatpush1.bf16.msra.mxu1 %v3264_v46  ;;  %v419_v45 = vld [vmem:[#allocation2 + $0x958] sm:$0xff] }
 0x15c   :  { %2791 = vmatprep.subr.bf16.mxu0 %v3271_v47  ;;  %2914 = vmatprep.subr.bf16.mxu1 %v3273_v48  ;;  %v423_v46 = vld [vmem:[#allocation2 + $0x978] sm:$0xff]  ;;  %v3326_v47 = vcombine.low %v410_v63, %v414_v36  ;;  %v3328_v48 = vcombine.low %v411_v37, %v415_v38  ;;  %v3383_v63 = vcombine.high %v466_v59, %v470_v30 }
 0x15d   :  { %v3337_v50 = vcombine.high %v419_v45, %v423_v46 }
 0x15f   :  { %2792 = vmatpush1.bf16.msra.mxu0 %v3270_v54  ;;  %2915 = vmatpush1.bf16.msra.mxu1 %v3272_v55  ;;  %v427_v54 = vld [vmem:[#allocation2 + $0x998] sm:$0xff] }
 0x160   :  { %2793 = vmatprep.subr.bf16.mxu0 %v3279_v56  ;;  %2916 = vmatprep.subr.bf16.mxu1 %v3281_v57  ;;  %v431_v55 = vld [vmem:[#allocation2 + $0x9b8] sm:$0xff]  ;;  %v3334_v56 = vcombine.low %v418_v44, %v422_v53  ;;  %v3336_v57 = vcombine.low %v419_v45, %v423_v46  ;;  %v482_v45 = vld [vmem:[#allocation2 + $0xb50] sm:$0xff] }
 0x161   :  { %v3345_v60 = vcombine.high %v427_v54, %v431_v55  ;;  %v486_v46 = vld [vmem:[#allocation2 + $0xb70] sm:$0xff] }
 0x163   :  { %2794 = vmatpush1.bf16.msra.mxu0 %v3278_v0  ;;  %2917 = vmatpush1.bf16.msra.mxu1 %v3280_v1  ;;  %v435_v0 = vld [vmem:[#allocation2 + $0x9d8] sm:$0xff] }
 0x164   :  { %2795 = vmatprep.subr.bf16.mxu0 %v3287_v2  ;;  %2918 = vmatprep.subr.bf16.mxu1 %v3289_v3  ;;  %v439_v1 = vld [vmem:[#allocation2 + $0x9f8] sm:$0xff]  ;;  %v3342_v2 = vcombine.low %v426_v51, %v430_v52  ;;  %v3344_v3 = vcombine.low %v427_v54, %v431_v55  ;;  %v3399_v51 = vcombine.high %v482_v45, %v486_v46  ;;  %v490_v54 = vld [vmem:[#allocation2 + $0xb90] sm:$0xff] }
 0x165   :  { %v3353_v5 = vcombine.high %v435_v0, %v439_v1  ;;  %v494_v55 = vld [vmem:[#allocation2 + $0xbb0] sm:$0xff] }
 0x167   :  { %2796 = vmatpush1.bf16.msra.mxu0 %v3286_v8  ;;  %2919 = vmatpush1.bf16.msra.mxu1 %v3288_v10  ;;  %v443_v8 = vld [vmem:[#allocation2 + $0xa18] sm:$0xff] }
 0x168   :  { %2806 = vmatprep.subr.bf16.mxu0 %v3295_v11  ;;  %2929 = vmatprep.subr.bf16.mxu1 %v3297_v12  ;;  %v447_v10 = vld [vmem:[#allocation2 + $0xa38] sm:$0xff]  ;;  %v3350_v11 = vcombine.low %v434_v61, %v438_v62  ;;  %v3352_v12 = vcombine.low %v435_v0, %v439_v1  ;;  %v3407_v61 = vcombine.high %v490_v54, %v494_v55  ;;  %v498_v0 = vld [vmem:[#allocation2 + $0xbd0] sm:$0xff] }
 0x169   :  { %v3361_v14 = vcombine.high %v443_v8, %v447_v10  ;;  %v502_v1 = vld [vmem:[#allocation2 + $0xbf0] sm:$0xff] }
 0x16a   :  { %2798 = vmatmul.mubr.bf16.vlgmr.msra.gmra.mrb[4].mxu0 %v3625_v40  ;;  %2921 = vmatmul.mubr.bf16.vlgmr.msra.gmra.mrb[4].mxu1 %v3625_v40  ;;  %v3312_v40 = vcombine.low %v395_v23, %v399_v9  ;;  %v458_v23 = vld [vmem:[#allocation2 + $0xa90] sm:$0xff] }
 0x16b   :  { %2807 = vmatpush1.bf16.msra.mxu0 %v3294_v17  ;;  %2930 = vmatpush1.bf16.msra.mxu1 %v3296_v18  ;;  %v451_v17 = vld [vmem:[#allocation2 + $0xa58] sm:$0xff]  ;;  %v462_v9 = vld [vmem:[#allocation2 + $0xab0] sm:$0xff] }
 0x16c   :  { %2808 = vmatprep.subr.bf16.mxu0 %v3303_v19  ;;  %2931 = vmatprep.subr.bf16.mxu1 %v3305_v20  ;;  %v455_v18 = vld [vmem:[#allocation2 + $0xa78] sm:$0xff]  ;;  %v3358_v19 = vcombine.low %v442_v6, %v446_v7  ;;  %v3360_v20 = vcombine.low %v443_v8, %v447_v10  ;;  %v3375_v28 = vcombine.high %v458_v23, %v462_v9 }
 0x16d   :  { %2838 = vmatprep.mubr.bf16.mxu0 %v3617_v35  ;;  %2961 = vmatprep.mubr.bf16.mxu1 %v3617_v35  ;;  %v3329_v35 = vcombine.high %v411_v37, %v415_v38  ;;  %v3369_v22 = vcombine.high %v451_v17, %v455_v18  ;;  %v474_v37 = vld [vmem:[#allocation2 + $0xb10] sm:$0xff]  ;;  %v3415_v6 = vcombine.high %v498_v0, %v502_v1 }
 0x16e   :  { %v478_v38 = vld [vmem:[#allocation2 + $0xb30] sm:$0xff]  ;;  %v3414_v8 = vcombine.low %v498_v0, %v502_v1 }
 0x16f   :  { %2809 = vmatpush1.bf16.msra.mxu0 %v3302_v24  ;;  %2932 = vmatpush1.bf16.msra.mxu1 %v3304_v25  ;;  %v459_v24 = vld [vmem:[#allocation2 + $0xa98] sm:$0xff]  ;;  %v3391_v44 = vcombine.high %v474_v37, %v478_v38 }
 0x170   :  { %2810 = vmatprep.subr.bf16.mxu0 %v3311_v26  ;;  %2933 = vmatprep.subr.bf16.mxu1 %v3313_v27  ;;  %v463_v25 = vld [vmem:[#allocation2 + $0xab8] sm:$0xff]  ;;  %v3366_v26 = vcombine.low %v450_v15, %v454_v16  ;;  %v3368_v27 = vcombine.low %v451_v17, %v455_v18  ;;  %v57_v15 = vsub.s32 2, %v3581_v43  ;;  %v61_v16 = vsub.s32 3, %v3581_v43  ;;  %v45_v17 = vld [vmem:[#allocation5] sm:$0xff] }
 0x171   :  { %v3377_v29 = vcombine.high %v459_v24, %v463_v25 }
 0x173   :  { %2811 = vmatpush1.bf16.msra.mxu0 %v3310_v32  ;;  %2934 = vmatpush1.bf16.msra.mxu1 %v3312_v40  ;;  %v467_v32 = vld [vmem:[#allocation2 + $0xad8] sm:$0xff] }
 0x174   :  { %2812 = vmatprep.subr.bf16.mxu0 %v3319_v33  ;;  %2935 = vmatprep.subr.bf16.mxu1 %v3321_v34  ;;  %v471_v40 = vld [vmem:[#allocation2 + $0xaf8] sm:$0xff]  ;;  %v3374_v33 = vcombine.low %v458_v23, %v462_v9  ;;  %v3376_v34 = vcombine.low %v459_v24, %v463_v25 }
 0x175   :  { %v3385_v36 = vcombine.high %v467_v32, %v471_v40 }
 0x177   :  { %2813 = vmatpush1.bf16.msra.mxu0 %v3318_v39  ;;  %2936 = vmatpush1.bf16.msra.mxu1 %v3320_v41  ;;  %v475_v39 = vld [vmem:[#allocation2 + $0xb18] sm:$0xff] }
 0x178   :  { %2814 = vmatprep.subr.bf16.mxu0 %v3327_v42  ;;  %2937 = vmatprep.subr.bf16.mxu1 %v3329_v35  ;;  %v479_v41 = vld [vmem:[#allocation2 + $0xb38] sm:$0xff]  ;;  %v3382_v42 = vcombine.low %v466_v59, %v470_v30  ;;  %v3384_v35 = vcombine.low %v467_v32, %v471_v40 }
 0x179   :  { %v3393_v53 = vcombine.high %v475_v39, %v479_v41 }
 0x17b   :  { %2815 = vmatpush1.bf16.msra.mxu0 %v3326_v47  ;;  %2938 = vmatpush1.bf16.msra.mxu1 %v3328_v48  ;;  %v483_v47 = vld [vmem:[#allocation2 + $0xb58] sm:$0xff] }
 0x17c   :  { %2816 = vmatprep.subr.bf16.mxu0 %v3335_v49  ;;  %2939 = vmatprep.subr.bf16.mxu1 %v3337_v50  ;;  %v487_v48 = vld [vmem:[#allocation2 + $0xb78] sm:$0xff]  ;;  %v3390_v49 = vcombine.low %v474_v37, %v478_v38  ;;  %v3392_v50 = vcombine.low %v475_v39, %v479_v41  ;;  %v65_v41 = vsub.s32 4, %v3581_v43 }
 0x17d   :  { %v3401_v52 = vcombine.high %v483_v47, %v487_v48 }
 0x17f   :  { %2817 = vmatpush1.bf16.msra.mxu0 %v3334_v56  ;;  %2940 = vmatpush1.bf16.msra.mxu1 %v3336_v57  ;;  %v491_v56 = vld [vmem:[#allocation2 + $0xb98] sm:$0xff] }
 0x180   :  { %2818 = vmatprep.subr.bf16.mxu0 %v3343_v58  ;;  %2941 = vmatprep.subr.bf16.mxu1 %v3345_v60  ;;  %v495_v57 = vld [vmem:[#allocation2 + $0xbb8] sm:$0xff]  ;;  %v3398_v58 = vcombine.low %v482_v45, %v486_v46  ;;  %v3400_v60 = vcombine.low %v483_v47, %v487_v48 }
 0x181   :  { %v3409_v62 = vcombine.high %v491_v56, %v495_v57 }
 0x183   :  { %2819 = vmatpush1.bf16.msra.mxu0 %v3342_v2  ;;  %2942 = vmatpush1.bf16.msra.mxu1 %v3344_v3  ;;  %v499_v2 = vld [vmem:[#allocation2 + $0xbd8] sm:$0xff] }
 0x184   :  { %2820 = vmatprep.subr.bf16.mxu0 %v3351_v4  ;;  %2943 = vmatprep.subr.bf16.mxu1 %v3353_v5  ;;  %v503_v3 = vld [vmem:[#allocation2 + $0xbf8] sm:$0xff]  ;;  %v3406_v4 = vcombine.low %v490_v54, %v494_v55  ;;  %v3408_v5 = vcombine.low %v491_v56, %v495_v57 }
 0x185   :  { %v3417_v7 = vcombine.high %v499_v2, %v503_v3  ;;  %v3416_v10 = vcombine.low %v499_v2, %v503_v3 }
 0x187   :  { %2821 = vmatpush1.bf16.msra.mxu0 %v3350_v11  ;;  %2944 = vmatpush1.bf16.msra.mxu1 %v3352_v12  ;;  %v3535_v11 = vmov 1983009808  }
 0x188   :  { %2822 = vmatprep.subr.bf16.mxu0 %v3359_v13  ;;  %2945 = vmatprep.subr.bf16.mxu1 %v3361_v14  ;;  %v82_v12 = vunpack.c.l.s4 %v3535_v11  ;;  %v49_v13 = vsub.s32 0, %v3581_v43  ;;  %v53_v14 = vsub.s32 1, %v3581_v43 }
 0x18a   :  { %v83_v18 = vunpack.c.0.s8 %v82_v12 }
 0x18b   :  { %2823 = vmatpush1.bf16.msra.mxu0 %v3358_v19  ;;  %2946 = vmatpush1.bf16.msra.mxu1 %v3360_v20  ;;  %v50_v19 = vrot.slane %v45_v17, %v49_v13  ;;  %v54_v20 = vrot.slane %v45_v17, %v53_v14 }
 0x18c   :  { %2824 = vmatprep.subr.bf16.mxu0 %v3367_v21  ;;  %2947 = vmatprep.subr.bf16.mxu1 %v3369_v22  ;;  %v58_v21 = vrot.slane %v45_v17, %v57_v15  ;;  %v62_v22 = vrot.slane %v45_v17, %v61_v16  ;;  %v86_v23 = vsub.s32 %v83_v18, %v3581_v43 }
 0x18d   :  { %v79_v9 = vcombine.low %v50_v19, %v54_v20 }
 0x18f   :  { %2825 = vmatpush1.bf16.msra.mxu0 %v3366_v26  ;;  %2948 = vmatpush1.bf16.msra.mxu1 %v3368_v27  ;;  %v87_v27 = vrot.slane %v79_v9, %v86_v23 }
 0x190   :  { %2826 = vmatprep.subr.bf16.mxu0 %v3375_v28  ;;  %2949 = vmatprep.subr.bf16.mxu1 %v3377_v29 }
 0x193   :  { %2827 = vmatpush1.bf16.msra.mxu0 %v3374_v33  ;;  %2950 = vmatpush1.bf16.msra.mxu1 %v3376_v34 }
 0x194   :  { %2828 = vmatprep.subr.bf16.mxu0 %v3383_v63  ;;  %2951 = vmatprep.subr.bf16.mxu1 %v3385_v36 }
 0x197   :  { %2829 = vmatpush1.bf16.msra.mxu0 %v3382_v42  ;;  %2952 = vmatpush1.bf16.msra.mxu1 %v3384_v35  ;;  %v69_v42 = vsub.s32 5, %v3581_v43  ;;  %v73_v35 = vsub.s32 6, %v3581_v43 }
 0x198   :  { %2830 = vmatprep.subr.bf16.mxu0 %v3391_v44  ;;  %2953 = vmatprep.subr.bf16.mxu1 %v3393_v53  ;;  %v77_v44 = vsub.s32 7, %v3581_v43  ;;  %v66_v53 = vrot.slane %v45_v17, %v65_v41 }
 0x199   :  { %v70_v45 = vrot.slane %v45_v17, %v69_v42  ;;  %v74_v46 = vrot.slane %v45_v17, %v73_v35 }
 0x19a   :  { %v78_v47 = vrot.slane %v45_v17, %v77_v44 }
 0x19b   :  { %2831 = vmatpush1.bf16.msra.mxu0 %v3390_v49  ;;  %2954 = vmatpush1.bf16.msra.mxu1 %v3392_v50  ;;  %v96_v48 = vcombine.low %v66_v53, %v70_v45 }
 0x19c   :  { %2832 = vmatprep.subr.bf16.mxu0 %v3399_v51  ;;  %2955 = vmatprep.subr.bf16.mxu1 %v3401_v52  ;;  %v97_v49 = vcombine.low %v74_v46, %v78_v47 }
 0x19d   :  { %v104_v54 = vrot.slane %v96_v48, %v86_v23 }
 0x19e   :  { %v111_v55 = vrot.slane %v97_v49, %v86_v23 }
 0x19f   :  { %2833 = vmatpush1.bf16.msra.mxu0 %v3398_v58  ;;  %2956 = vmatpush1.bf16.msra.mxu1 %v3400_v60 }
 0x1a0   :  { %2834 = vmatprep.subr.bf16.mxu0 %v3407_v61  ;;  %2957 = vmatprep.subr.bf16.mxu1 %v3409_v62  ;;  %v112_v43 = vcombine.low %v104_v54, %v111_v55 }
 0x1a3   :  { %2835 = vmatpush1.bf16.msra.mxu0 %v3406_v4  ;;  %2958 = vmatpush1.bf16.msra.mxu1 %v3408_v5 }
 0x1a4   :  { %2836 = vmatprep.subr.bf16.mxu0 %v3415_v6  ;;  %2959 = vmatprep.subr.bf16.mxu1 %v3417_v7 }
 0x1a7   :  { %2837 = vmatpush1.bf16.msra.mxu0 %v3414_v8  ;;  %2960 = vmatpush1.bf16.msra.mxu1 %v3416_v10 }
 0x1aa   :  { %2839 = vmatmul.mubr.bf16.vlgmr.msra.gmra.mrb[4].mxu0 %v3610_v31  ;;  %2962 = vmatmul.mubr.bf16.vlgmr.msra.gmra.mrb[4].mxu1 %v3610_v31  ;;  %v80_v31 = vcombine.low %v58_v21, %v62_v22 }
 0x1ac   :  { %v94_v28 = vrot.slane %v80_v31, %v86_v23 }
 0x1ae   :  { %v95_v36 = vcombine.low %v87_v27, %v94_v28 }
 0x1bd   :  { %v2594_v24 = vpop.f32.mrb[0].mxu0  ;;  %v2717_v25 = vpop.f32.mrb[0].mxu1 }
 0x1be   :  { %v2596_v26 = vpop.f32.mrb[1].mxu0  ;;  %v2719_v59 = vpop.f32.mrb[1].mxu1 }
 0x1bf   :  { %v2978_v29 = vcombine.low %v2594_v24, %v2596_v26  ;;  %v2598_v30 = vpop.f32.mrb[2].mxu0  ;;  %v2979_v32 = vcombine.low %v2717_v25, %v2719_v59  ;;  %v2721_v40 = vpop.f32.mrb[2].mxu1 }
 0x1c0   :  { %v2599_v33 = vpop.f32.mrb[3].mxu0  ;;  %v2722_v63 = vpop.f32.mrb[3].mxu1 }
 0x1c1   :  { %v2986_v34 = vrot.slane %v2978_v29, %v86_v23  ;;  %v2993_v37 = vrot.slane %v2979_v32, %v86_v23 }
 0x1c3   :  { %v2994_v38 = vcombine.low %v2986_v34, %v2993_v37 }
 0x1c5   :  { %v3014_v39 = vadd.f32 %v2994_v38, %v95_v36 }
 0x1c7   :  { %3016 = vst [vmem:[#allocation7] sm:$0xff] %v3014_v39 }
 0x27d   :  { %v2840_v50 = vpop.f32.mrb[4].mxu0  ;;  %v2963_v51 = vpop.f32.mrb[4].mxu1 }
 0x27e   :  { %v2842_v52 = vpop.f32.mrb[5].mxu0  ;;  %v2965_v57 = vpop.f32.mrb[5].mxu1 }
 0x27f   :  { %v2995_v56 = vcombine.low %v2840_v50, %v2842_v52  ;;  %v2844_v58 = vpop.f32.mrb[6].mxu0  ;;  %v2996_v60 = vcombine.low %v2963_v51, %v2965_v57  ;;  %v2967_v61 = vpop.f32.mrb[6].mxu1 }
 0x280   :  { %v2845_v62 = vpop.f32.mrb[7].mxu0  ;;  %v2968_v1 = vpop.f32.mrb[7].mxu1 }
 0x281   :  { %v3003_v0 = vrot.slane %v2995_v56, %v86_v23  ;;  %v3010_v2 = vrot.slane %v2996_v60, %v86_v23 }
 0x283   :  { %v3011_v3 = vcombine.low %v3003_v0, %v3010_v2 }
 0x285   :  { %v3015_v4 = vadd.f32 %v3011_v3, %v112_v43 }
 0x287   :  { %3017 = vst [vmem:[#allocation7 + $0x8] sm:$0xff] %v3015_v4 }
 0x288   :  { %3513 = shalt.err (!%p3510_p6)
}
 0x289   :  { %s3514_s15 = scalar_lea.hbm %s3669_s3, 256 }
 0x28a   :  { %p3515_p7 = scmp.ne.s32.totalorder %s3669_s3, %s3514_s15  ;;  %p3518_p8 = scmp.lt.u32.totalorder %s3514_s15, %s3669_s3 }
 0x28c   :  { %p3520_p9 = pnand %p3518_p8, %p3515_p7 }
 0x28e   :  { %3523 = shalt.err (!%p3520_p9)
}
 0x28f   :  { %3027 = dma.vmem_to_hbm [thread:$0]  %s3025_s11, 256, %s3669_s3, [#allocation4]  }
 0x290   :  { %3528 = dma.done.wait [#allocation4], 256  }
 0x291   :  { %3529 = vsyncadd [#allocation4], 4294967040 }
 0x292   :  { %3031 = vsyncpa [#allocation3], 1 }
 0x293   :  { %3032 = vsyncpa [#allocation6], 1 }
 0x294   :  { %3033 = vsyncpa [#allocation4], 1 }

</bundles_post_ra>
